<compile_context>
chip_gen: v5e
topology: v5e:2x2
jax: 0.10.0
libtpu: 0.0.40
codegen_flags: <defaults>
</compile_context>

<pallas_src>
import jax
import jax.numpy as jnp
from jax.experimental import pallas as pl
from jax.experimental.pallas import tpu as pltpu

ANCHOR_SCALES = [4, 8, 16, 32, 64, 128]
ANCHOR_RATIOS = [0.25, 0.5, 0.75, 1.0, 1.5, 2.0]
A = len(ANCHOR_SCALES) * len(ANCHOR_RATIOS)      # 36
NUM_HEAD = 6 * A                                 # 216 = 2A cls + 4A reg


def _round_up(x, m):
    return ((x + m - 1) // m) * m


def _pick_band_rows(H, max_rows):
    """Largest multiple-of-8 divisor of H that is <= max_rows (else whole H)."""
    if H <= max_rows:
        return H
    best = 0
    for bh in range(8, max_rows + 1, 8):
        if H % bh == 0:
            best = bh
    if best:
        return best
    # TODO(synk): pad H to a band multiple for awkward heights on VMEM-tight parts.
    return H


def _make_rpn_kernel(BH, W, Wp, C, Cp, HP):
    """Per-(image, row-band) kernel for static (band rows, W, padded-W, C, ...)."""

    def kernel(xm_ref, xtop_ref, xbot_ref, w9_ref, b3_ref, wh_ref, bh_ref,
               out_ref, band_ref):
        b = pl.program_id(1)
        nb = pl.num_programs(1)

        # 1) Assemble the haloed band in VMEM:
        #    band_ref[r] == spatially-padded image row (b*BH + r), r in [0, BH+2)
        band_ref[1:BH + 1] = xm_ref[0]

        @pl.when(b == 0)                                 # top image edge -> zeros
        def _():
            band_ref[0:1] = jnp.zeros((1, Wp, C), jnp.bfloat16)

        @pl.when(b > 0)                                  # real 1-row top halo
        def _():
            band_ref[0:1] = xtop_ref[0]

        @pl.when(b == nb - 1)                            # bottom image edge -> zeros
        def _():
            band_ref[BH + 1:BH + 2] = jnp.zeros((1, Wp, C), jnp.bfloat16)

        @pl.when(b < nb - 1)                             # real 1-row bottom halo
        def _():
            band_ref[BH + 1:BH + 2] = xbot_ref[0]

        # 2) 3x3 'same' conv as 9 MXU matmuls (K=C, N=Cp).  Each dx sublane
        #    shift is materialized once and reused for the 3 dy taps, which are
        #    leading-dim slices (layout-free reshape when W % 8 == 0).
        acc = None
        for dx in range(3):
            shifted = band_ref[:, dx:dx + W, :]          # (BH+2, W, C) bf16
            for dy in range(3):
                lhs = shifted[dy:dy + BH].reshape(BH * W, C)
                part = jnp.dot(lhs, w9_ref[3 * dy + dx],
                               preferred_element_type=jnp.float32)
                acc = part if acc is None else acc + part

        # bias + ReLU in f32 on the VPU; padded output channels stay exactly 0.
        shared = jnp.maximum(acc + b3_ref[...], 0.0)     # (BH*W, Cp) f32

        # 3) Fused, lane-dense heads: single (BH*W, Cp) @ (Cp, 256) matmul and
        #    one unmasked 256-wide store.
        heads = jnp.dot(shared.astype(jnp.bfloat16), wh_ref[...],
                        preferred_element_type=jnp.float32) + bh_ref[...]
        out_ref[0] = heads.reshape(BH, W, HP)

    return kernel


def _vmem_limit_bytes(BH, W, Wp, C, Cp, HP):
    """Generation-aware VMEM budget (<= 0.85 * physical VMEM)."""
    x_main = BH * Wp * C * 2                    # bf16 main band block
    x_halo = 2 * Wp * C * 2                     # two 1-row halo blocks
    out_blk = BH * W * HP * 4                   # f32 fused head slab
    weights = 9 * C * Cp * 2 + Cp * HP * 2 + (Cp + HP) * 4
    band = (BH + 2) * Wp * C * 2                # assembly scratch
    work = BH * W * (Cp * 4 + Cp * 4 + Cp * 2 + HP * 4) + (BH + 2) * W * C * 2
    need = 2 * (x_main + x_halo + out_blk) + weights + band + work   # 2 = dbl buf
    need = int(need * 1.25) + (2 << 20)         # modest pipeliner headroom
    try:
        cap = int(pltpu.get_tpu_info().vmem_capacity_bytes)
    except Exception:
        cap = 64 << 20                          # conservative (v7x-safe) fallback
    return int(min(max(need, 16 << 20), int(0.85 * cap)))


def prepare_params(params, C):
    """One-time parameter preprocessing (hoisted out of the per-call path)."""
    Cp = max(128, _round_up(C, 128))            # padded conv-output / head-K dim
    HP = _round_up(NUM_HEAD, 128)               # fused head width, 216 -> 256

    # 3x3 weights (3,3,Cin,Cout) -> (9, C, Cp) bf16 (Cout zero-padded to Cp).
    w3p = jnp.pad(params["w3"], ((0, 0), (0, 0), (0, 0), (0, Cp - C)))
    w9 = w3p.reshape(9, C, Cp).astype(jnp.bfloat16)
    b3p = jnp.pad(params["b3"], (0, Cp - C)).reshape(1, Cp)          # f32

    # Fused, lane-padded 1x1 heads: cols [0:2A)=cls, [2A:6A)=reg, rest zero.
    wh = jnp.zeros((Cp, HP), jnp.float32)
    wh = wh.at[:C, :2 * A].set(params["wc"])
    wh = wh.at[:C, 2 * A:6 * A].set(params["wr"])
    wh = wh.astype(jnp.bfloat16)
    bh = jnp.zeros((1, HP), jnp.float32)
    bh = bh.at[0, :2 * A].set(params["bc"])
    bh = bh.at[0, 2 * A:6 * A].set(params["br"])

    return {"w9": w9, "b3": b3p, "wh": wh, "bh": bh,
            "C": C, "Cp": Cp, "HP": HP}


def rpn_heads_pallas(x_nchw, prep, *, max_band_rows=64):
    """feature_extractor (3x3 conv + ReLU) + both 1x1 heads, row-band tiled.

    Returns (cls_nhwc, reg_nhwc) with shapes (N,H,W,2A), (N,H,W,4A) in f32.
    """
    N, C, H, W = x_nchw.shape
    assert C == prep["C"]
    Cp, HP = prep["Cp"], prep["HP"]
    Wp = W + 2
    BH = _pick_band_rows(H, max_band_rows)
    NB = H // BH

    # NCHW -> NHWC, cast to bf16, 1-px width halo only (H halo handled in-kernel,
    # channel dim stays the true C -> no inflated input DMA at small C).
    # TODO(synk): accept NHWC activations directly to skip this transpose.
    x_w = jnp.pad(jnp.transpose(x_nchw, (0, 2, 3, 1)).astype(jnp.bfloat16),
                  ((0, 0), (0, 0), (1, 1), (0, 0)))        # (N, H, W+2, C) bf16

    kernel = _make_rpn_kernel(BH, W, Wp, C, Cp, HP)

    grid_spec = pltpu.PrefetchScalarGridSpec(
        num_scalar_prefetch=0,
        grid=(N, NB),
        in_specs=[
            # main band: rows [b*BH, (b+1)*BH)
            pl.BlockSpec((1, BH, Wp, C), lambda n, b: (n, b, 0, 0)),
            # 1-row top halo: row b*BH - 1 (clamped; zero-masked at b == 0)
            pl.BlockSpec((1, 1, Wp, C),
                         lambda n, b: (n, jnp.maximum(b * BH - 1, 0), 0, 0)),
            # 1-row bottom halo: row (b+1)*BH (clamped; zero-masked at last band)
            pl.BlockSpec((1, 1, Wp, C),
                         lambda n, b: (n, jnp.minimum((b + 1) * BH, H - 1), 0, 0)),
            pl.BlockSpec((9, C, Cp), lambda n, b: (0, 0, 0)),
            pl.BlockSpec((1, Cp), lambda n, b: (0, 0)),
            pl.BlockSpec((Cp, HP), lambda n, b: (0, 0)),
            pl.BlockSpec((1, HP), lambda n, b: (0, 0)),
        ],
        out_specs=pl.BlockSpec((1, BH, W, HP), lambda n, b: (n, b, 0, 0)),
        scratch_shapes=[pltpu.VMEM((BH + 2, Wp, C), jnp.bfloat16)],
    )

    heads = pl.pallas_call(
        kernel,
        out_shape=jax.ShapeDtypeStruct((N, H, W, HP), jnp.float32),
        grid_spec=grid_spec,
        compiler_params=pltpu.CompilerParams(
            dimension_semantics=("parallel", "parallel"),
            vmem_limit_bytes=_vmem_limit_bytes(BH, W, Wp, C, Cp, HP)),
    )(x_w, x_w, x_w, prep["w9"], prep["b3"], prep["wh"], prep["bh"])

    cls_nhwc = heads[..., :2 * A]               # (N, H, W, 72)
    reg_nhwc = heads[..., 2 * A:6 * A]          # (N, H, W, 144)
    return cls_nhwc, reg_nhwc


def generate_anchors(H, W):
    """Pure-JAX replica of RegionProposalNetwork.generate_anchors."""
    scale_factors = [1.0, 0.75, 0.5, 0.25]
    stride_y = max(1, H // 16)
    stride_x = max(1, W // 8)
    shifts_x = jnp.arange(0, W, stride_x, dtype=jnp.float32)
    shifts_y = jnp.arange(0, H, stride_y, dtype=jnp.float32)
    shift_y, shift_x = jnp.meshgrid(shifts_y, shifts_x, indexing="ij")

    anchors = []
    for f in scale_factors:
        w = W * f
        h = H * f
        anchors.append(jnp.array([-w / 2, -h / 2, w / 2, h / 2], jnp.float32))
    for f in scale_factors:
        w = max(1.0, W * f * 0.5)
        h = H * f
        anchors.append(jnp.array([-w / 2, -h / 2, w / 2, h / 2], jnp.float32))
    for f in scale_factors:
        w = W * f
        h = max(1.0, H * f * 0.5)
        anchors.append(jnp.array([-w / 2, -h / 2, w / 2, h / 2], jnp.float32))

    base_anchors = jnp.stack(anchors)                           # (12, 4)
    shifts = jnp.stack(
        [shift_x.reshape(-1), shift_y.reshape(-1),
         shift_x.reshape(-1), shift_y.reshape(-1)], axis=1)     # (S, 4)
    all_anchors = base_anchors.reshape(1, -1, 4) + shifts.reshape(-1, 1, 4)
    return all_anchors.reshape(-1, 4)


def region_proposal_network_forward(x_nchw, prep, *, max_band_rows=64):
    """Full forward pass matching the PyTorch module semantics."""
    N, C, H, W = x_nchw.shape
    cls_nhwc, reg_nhwc = rpn_heads_pallas(x_nchw, prep,
                                          max_band_rows=max_band_rows)

    objectness_logits = cls_nhwc.reshape(N, H * W * A, 2)
    bbox_deltas = reg_nhwc.reshape(N, H * W * A, 4)

    all_anchors = generate_anchors(H, W)
    num_predictions = H * W * A
    num_anchors = all_anchors.shape[0]
    if num_anchors < num_predictions:
        pad = num_predictions - num_anchors
        padding = jnp.tile(all_anchors[-1:], (pad, 1))
        anchors_out = jnp.concatenate([all_anchors, padding], axis=0)
    elif num_anchors > num_predictions:
        anchors_out = all_anchors[:num_predictions]
    else:
        anchors_out = all_anchors
    return objectness_logits, bbox_deltas, anchors_out


def init_params(key, C):
    """Deterministic synthetic params (PyTorch OIHW layouts, then converted).

    Weights are rounded once to bf16-representable values so the Pallas kernel
    (bf16 MXU operands, f32 accumulation) and the f32 reference see identical
    operand values.
    """
    k1, k2, k3, k4, k5, k6 = jax.random.split(key, 6)

    def q(a):  # snap to bf16 grid, keep f32 container
        return a.astype(jnp.bfloat16).astype(jnp.float32)

    w3_oihw = q(jax.random.normal(k1, (C, C, 3, 3), jnp.float32) * 0.1)
    wc_oihw = q(jax.random.normal(k2, (2 * A, C, 1, 1), jnp.float32) * 0.1)
    wr_oihw = q(jax.random.normal(k3, (4 * A, C, 1, 1), jnp.float32) * 0.1)
    b3 = jax.random.normal(k4, (C,), jnp.float32) * 0.01
    bc = jax.random.normal(k5, (2 * A,), jnp.float32) * 0.01
    br = jax.random.normal(k6, (4 * A,), jnp.float32) * 0.01
    return {
        "w3": jnp.transpose(w3_oihw, (2, 3, 1, 0)),      # (3,3,Cin,Cout)
        "b3": b3,
        "wc": wc_oihw[:, :, 0, 0].T,                     # (Cin, 2A)
        "bc": bc,
        "wr": wr_oihw[:, :, 0, 0].T,                     # (Cin, 4A)
        "br": br,
        "_w3_oihw": w3_oihw, "_wc_oihw": wc_oihw, "_wr_oihw": wr_oihw,
    }


def _reference_forward(x_nchw, params):
    """Pure-JAX (lax.conv, f32 HIGHEST precision) reference.

    Mirrors the kernel's dtype policy by quantizing the shared activation to
    bf16 before the head convs, so the comparison is tight.
    """
    N, C, H, W = x_nchw.shape
    dn = ("NCHW", "OIHW", "NCHW")
    hp = jax.lax.Precision.HIGHEST
    y = jax.lax.conv_general_dilated(
        x_nchw, params["_w3_oihw"], (1, 1), "SAME",
        dimension_numbers=dn, precision=hp)
    y = jnp.maximum(y + params["b3"][None, :, None, None], 0.0)
    y = y.astype(jnp.bfloat16).astype(jnp.float32)
    cls = jax.lax.conv_general_dilated(
        y, params["_wc_oihw"], (1, 1), "SAME",
        dimension_numbers=dn, precision=hp)
    cls = cls + params["bc"][None, :, None, None]
    reg = jax.lax.conv_general_dilated(
        y, params["_wr_oihw"], (1, 1), "SAME",
        dimension_numbers=dn, precision=hp)
    reg = reg + params["br"][None, :, None, None]
    cls = jnp.transpose(cls, (0, 2, 3, 1)).reshape(N, H * W * A, 2)
    reg = jnp.transpose(reg, (0, 2, 3, 1)).reshape(N, H * W * A, 4)
    return cls, reg


if __name__ == "__main__":
    N, C, H, W = 2, 4, 16, 16
    key = jax.random.PRNGKey(0)
    x = jax.random.normal(key, (N, C, H, W), jnp.float32)
    # snap inputs to bf16-representable values (kernel feeds the MXU in bf16)
    x = x.astype(jnp.bfloat16).astype(jnp.float32)
    params = init_params(jax.random.PRNGKey(42), C)
    prep = prepare_params(params, C)          # one-time, hoisted out of forward

    # Banded path (BH=8 -> 2 bands per image) exercises the halo machinery;
    # default path (single band) covers the no-banding case.
    obj_b, del_b, anchors = region_proposal_network_forward(
        x, prep, max_band_rows=8)
    obj_1, del_1, _ = region_proposal_network_forward(x, prep)
    jax.block_until_ready((obj_b, del_b, obj_1, del_1, anchors))

    # sanity-check against pure-JAX reference
    ref_obj, ref_del = _reference_forward(x, params)
    assert obj_b.shape == (N, H * W * A, 2)
    assert del_b.shape == (N, H * W * A, 4)
    assert anchors.shape == (H * W * A, 4)
    assert jnp.allclose(obj_b, ref_obj, atol=2e-3, rtol=2e-3)
    assert jnp.allclose(del_b, ref_del, atol=2e-3, rtol=2e-3)
    assert jnp.allclose(obj_1, ref_obj, atol=2e-3, rtol=2e-3)
    assert jnp.allclose(del_1, ref_del, atol=2e-3, rtol=2e-3)

    print("KERNEL_OK")
</pallas_src>

<mosaic_0001>
module attributes {stable_mosaic.version = 11 : i64} {
  func.func @kernel(%arg0: i32, %arg1: i32, %arg2: memref<1x8x18x4xbf16, #tpu.memory_space<vmem>>, %arg3: memref<1x1x18x4xbf16, #tpu.memory_space<vmem>>, %arg4: memref<1x1x18x4xbf16, #tpu.memory_space<vmem>>, %arg5: memref<9x4x128xbf16, #tpu.memory_space<vmem>>, %arg6: memref<1x128xf32, #tpu.memory_space<vmem>>, %arg7: memref<128x256xbf16, #tpu.memory_space<vmem>>, %arg8: memref<1x256xf32, #tpu.memory_space<vmem>>, %arg9: memref<1x8x16x256xf32, #tpu.memory_space<vmem>>, %arg10: memref<10x18x4xbf16, #tpu.memory_space<vmem>>) attributes {dimension_semantics = [#tpu.dimension_semantics<parallel>, #tpu.dimension_semantics<parallel>], iteration_bounds = array<i64: 2, 2>, scalar_prefetch = 0 : i64, scratch_operands = 1 : i64, tpu.core_type = #tpu.core_type<tc>, window_params = [{transform_indices = @transform_0, window_bounds = array<i64: 1, 8, 18, 4>}, {transform_indices = @transform_1, window_bounds = array<i64: 1, 1, 18, 4>}, {transform_indices = @transform_2, window_bounds = array<i64: 1, 1, 18, 4>}, {pipeline_mode = #tpu.pipeline_mode<synchronous>, transform_indices = @transform_3, window_bounds = array<i64: 9, 4, 128>}, {pipeline_mode = #tpu.pipeline_mode<synchronous>, transform_indices = @transform_4, window_bounds = array<i64: 1, 128>}, {pipeline_mode = #tpu.pipeline_mode<synchronous>, transform_indices = @transform_5, window_bounds = array<i64: 128, 256>}, {pipeline_mode = #tpu.pipeline_mode<synchronous>, transform_indices = @transform_6, window_bounds = array<i64: 1, 256>}, {transform_indices = @transform_7, window_bounds = array<i64: 1, 8, 16, 256>}]} {
    %c0 = arith.constant 0 : index
    %c0_0 = arith.constant 0 : index
    %c0_1 = arith.constant 0 : index
    %c0_2 = arith.constant 0 : index
    %0 = vector.load %arg2[%c0, %c0_0, %c0_1, %c0_2] : memref<1x8x18x4xbf16, #tpu.memory_space<vmem>>, vector<1x8x18x4xbf16>
    %1 = vector.shape_cast %0 : vector<1x8x18x4xbf16> to vector<8x18x4xbf16>
    %c1 = arith.constant 1 : index
    %c0_3 = arith.constant 0 : index
    %c0_4 = arith.constant 0 : index
    %2 = vector.load %arg10[%c1, %c0_3, %c0_4] : memref<10x18x4xbf16, #tpu.memory_space<vmem>>, vector<8x18x4xbf16>
    tpu.vector_store %arg10[%c1, %c0_3, %c0_4], %1 {strides = array<i32>} : memref<10x18x4xbf16, #tpu.memory_space<vmem>>, vector<8x18x4xbf16>,
    %c0_i32 = arith.constant 0 : i32
    %3 = arith.cmpi eq, %arg1, %c0_i32 : i32
    %4 = arith.extui %3 : i1 to i32
    %c0_i32_5 = arith.constant 0 : i32
    %5 = arith.cmpi ne, %4, %c0_i32_5 : i32
    scf.if %5 {
      %cst_60 = arith.constant 0.000000e+00 : bf16
      %86 = vector.broadcast %cst_60 : bf16 to vector<1x18x4xbf16>
      %c0_61 = arith.constant 0 : index
      %c0_62 = arith.constant 0 : index
      %c0_63 = arith.constant 0 : index
      %87 = vector.load %arg10[%c0_61, %c0_62, %c0_63] : memref<10x18x4xbf16, #tpu.memory_space<vmem>>, vector<1x18x4xbf16>
      tpu.vector_store %arg10[%c0_61, %c0_62, %c0_63], %86 {strides = array<i32>} : memref<10x18x4xbf16, #tpu.memory_space<vmem>>, vector<1x18x4xbf16>,
    } else {
    }
    %c0_i32_6 = arith.constant 0 : i32
    %6 = arith.cmpi sgt, %arg1, %c0_i32_6 : i32
    %7 = arith.extui %6 : i1 to i32
    %c0_i32_7 = arith.constant 0 : i32
    %8 = arith.cmpi ne, %7, %c0_i32_7 : i32
    scf.if %8 {
      %c0_60 = arith.constant 0 : index
      %c0_61 = arith.constant 0 : index
      %c0_62 = arith.constant 0 : index
      %c0_63 = arith.constant 0 : index
      %86 = vector.load %arg3[%c0_60, %c0_61, %c0_62, %c0_63] : memref<1x1x18x4xbf16, #tpu.memory_space<vmem>>, vector<1x1x18x4xbf16>
      %87 = vector.shape_cast %86 : vector<1x1x18x4xbf16> to vector<1x18x4xbf16>
      %c0_64 = arith.constant 0 : index
      %c0_65 = arith.constant 0 : index
      %c0_66 = arith.constant 0 : index
      %88 = vector.load %arg10[%c0_64, %c0_65, %c0_66] : memref<10x18x4xbf16, #tpu.memory_space<vmem>>, vector<1x18x4xbf16>
      tpu.vector_store %arg10[%c0_64, %c0_65, %c0_66], %87 {strides = array<i32>} : memref<10x18x4xbf16, #tpu.memory_space<vmem>>, vector<1x18x4xbf16>,
    } else {
    }
    %c1_i32 = arith.constant 1 : i32
    %9 = arith.cmpi eq, %arg1, %c1_i32 : i32
    %10 = arith.extui %9 : i1 to i32
    %c0_i32_8 = arith.constant 0 : i32
    %11 = arith.cmpi ne, %10, %c0_i32_8 : i32
    scf.if %11 {
      %cst_60 = arith.constant 0.000000e+00 : bf16
      %86 = vector.broadcast %cst_60 : bf16 to vector<1x18x4xbf16>
      %c9 = arith.constant 9 : index
      %c0_61 = arith.constant 0 : index
      %c0_62 = arith.constant 0 : index
      %87 = vector.load %arg10[%c9, %c0_61, %c0_62] : memref<10x18x4xbf16, #tpu.memory_space<vmem>>, vector<1x18x4xbf16>
      tpu.vector_store %arg10[%c9, %c0_61, %c0_62], %86 {strides = array<i32>} : memref<10x18x4xbf16, #tpu.memory_space<vmem>>, vector<1x18x4xbf16>,
    } else {
    }
    %c1_i32_9 = arith.constant 1 : i32
    %12 = arith.cmpi slt, %arg1, %c1_i32_9 : i32
    %13 = arith.extui %12 : i1 to i32
    %c0_i32_10 = arith.constant 0 : i32
    %14 = arith.cmpi ne, %13, %c0_i32_10 : i32
    scf.if %14 {
      %c0_60 = arith.constant 0 : index
      %c0_61 = arith.constant 0 : index
      %c0_62 = arith.constant 0 : index
      %c0_63 = arith.constant 0 : index
      %86 = vector.load %arg4[%c0_60, %c0_61, %c0_62, %c0_63] : memref<1x1x18x4xbf16, #tpu.memory_space<vmem>>, vector<1x1x18x4xbf16>
      %87 = vector.shape_cast %86 : vector<1x1x18x4xbf16> to vector<1x18x4xbf16>
      %c9 = arith.constant 9 : index
      %c0_64 = arith.constant 0 : index
      %c0_65 = arith.constant 0 : index
      %88 = vector.load %arg10[%c9, %c0_64, %c0_65] : memref<10x18x4xbf16, #tpu.memory_space<vmem>>, vector<1x18x4xbf16>
      tpu.vector_store %arg10[%c9, %c0_64, %c0_65], %87 {strides = array<i32>} : memref<10x18x4xbf16, #tpu.memory_space<vmem>>, vector<1x18x4xbf16>,
    } else {
    }
    %c0_11 = arith.constant 0 : index
    %c0_12 = arith.constant 0 : index
    %c0_13 = arith.constant 0 : index
    %15 = vector.load %arg10[%c0_11, %c0_12, %c0_13] : memref<10x18x4xbf16, #tpu.memory_space<vmem>>, vector<10x16x4xbf16>
    %16 = vector.extract_strided_slice %15 {offsets = [0, 0, 0], sizes = [8, 16, 4], strides = [1, 1, 1]} : vector<10x16x4xbf16> to vector<8x16x4xbf16>
    %17 = vector.shape_cast %16 : vector<8x16x4xbf16> to vector<128x4xbf16>
    %c0_14 = arith.constant 0 : index
    %c0_15 = arith.constant 0 : index
    %c0_16 = arith.constant 0 : index
    %18 = vector.load %arg5[%c0_14, %c0_15, %c0_16] : memref<9x4x128xbf16, #tpu.memory_space<vmem>>, vector<1x4x128xbf16>
    %19 = vector.shape_cast %18 : vector<1x4x128xbf16> to vector<4x128xbf16>
    %cst = arith.constant dense<0.000000e+00> : vector<128x128xf32>
    %20 = tpu.matmul %17, %19, %cst {dimension_numbers = #tpu.dot_dimension_numbers<[1], [0], [0], [1], [0, 0, 1, 1], [], []>} : vector<128x4xbf16>, vector<4x128xbf16>, vector<128x128xf32> -> vector<128x128xf32>
    %21 = vector.extract_strided_slice %15 {offsets = [1, 0, 0], sizes = [8, 16, 4], strides = [1, 1, 1]} : vector<10x16x4xbf16> to vector<8x16x4xbf16>
    %22 = vector.shape_cast %21 : vector<8x16x4xbf16> to vector<128x4xbf16>
    %c3 = arith.constant 3 : index
    %c0_17 = arith.constant 0 : index
    %c0_18 = arith.constant 0 : index
    %23 = vector.load %arg5[%c3, %c0_17, %c0_18] : memref<9x4x128xbf16, #tpu.memory_space<vmem>>, vector<1x4x128xbf16>
    %24 = vector.shape_cast %23 : vector<1x4x128xbf16> to vector<4x128xbf16>
    %cst_19 = arith.constant dense<0.000000e+00> : vector<128x128xf32>
    %25 = tpu.matmul %22, %24, %cst_19 {dimension_numbers = #tpu.dot_dimension_numbers<[1], [0], [0], [1], [0, 0, 1, 1], [], []>} : vector<128x4xbf16>, vector<4x128xbf16>, vector<128x128xf32> -> vector<128x128xf32>
    %26 = arith.addf %20, %25 : vector<128x128xf32>
    %27 = vector.extract_strided_slice %15 {offsets = [2, 0, 0], sizes = [8, 16, 4], strides = [1, 1, 1]} : vector<10x16x4xbf16> to vector<8x16x4xbf16>
    %28 = vector.shape_cast %27 : vector<8x16x4xbf16> to vector<128x4xbf16>
    %c6 = arith.constant 6 : index
    %c0_20 = arith.constant 0 : index
    %c0_21 = arith.constant 0 : index
    %29 = vector.load %arg5[%c6, %c0_20, %c0_21] : memref<9x4x128xbf16, #tpu.memory_space<vmem>>, vector<1x4x128xbf16>
    %30 = vector.shape_cast %29 : vector<1x4x128xbf16> to vector<4x128xbf16>
    %cst_22 = arith.constant dense<0.000000e+00> : vector<128x128xf32>
    %31 = tpu.matmul %28, %30, %cst_22 {dimension_numbers = #tpu.dot_dimension_numbers<[1], [0], [0], [1], [0, 0, 1, 1], [], []>} : vector<128x4xbf16>, vector<4x128xbf16>, vector<128x128xf32> -> vector<128x128xf32>
    %32 = arith.addf %26, %31 : vector<128x128xf32>
    %c0_23 = arith.constant 0 : index
    %c1_24 = arith.constant 1 : index
    %c0_25 = arith.constant 0 : index
    %33 = vector.load %arg10[%c0_23, %c1_24, %c0_25] : memref<10x18x4xbf16, #tpu.memory_space<vmem>>, vector<10x16x4xbf16>
    %34 = vector.extract_strided_slice %33 {offsets = [0, 0, 0], sizes = [8, 16, 4], strides = [1, 1, 1]} : vector<10x16x4xbf16> to vector<8x16x4xbf16>
    %35 = vector.shape_cast %34 : vector<8x16x4xbf16> to vector<128x4xbf16>
    %c1_26 = arith.constant 1 : index
    %c0_27 = arith.constant 0 : index
    %c0_28 = arith.constant 0 : index
    %36 = vector.load %arg5[%c1_26, %c0_27, %c0_28] : memref<9x4x128xbf16, #tpu.memory_space<vmem>>, vector<1x4x128xbf16>
    %37 = vector.shape_cast %36 : vector<1x4x128xbf16> to vector<4x128xbf16>
    %cst_29 = arith.constant dense<0.000000e+00> : vector<128x128xf32>
    %38 = tpu.matmul %35, %37, %cst_29 {dimension_numbers = #tpu.dot_dimension_numbers<[1], [0], [0], [1], [0, 0, 1, 1], [], []>} : vector<128x4xbf16>, vector<4x128xbf16>, vector<128x128xf32> -> vector<128x128xf32>
    %39 = arith.addf %32, %38 : vector<128x128xf32>
    %40 = vector.extract_strided_slice %33 {offsets = [1, 0, 0], sizes = [8, 16, 4], strides = [1, 1, 1]} : vector<10x16x4xbf16> to vector<8x16x4xbf16>
    %41 = vector.shape_cast %40 : vector<8x16x4xbf16> to vector<128x4xbf16>
    %c4 = arith.constant 4 : index
    %c0_30 = arith.constant 0 : index
    %c0_31 = arith.constant 0 : index
    %42 = vector.load %arg5[%c4, %c0_30, %c0_31] : memref<9x4x128xbf16, #tpu.memory_space<vmem>>, vector<1x4x128xbf16>
    %43 = vector.shape_cast %42 : vector<1x4x128xbf16> to vector<4x128xbf16>
    %cst_32 = arith.constant dense<0.000000e+00> : vector<128x128xf32>
    %44 = tpu.matmul %41, %43, %cst_32 {dimension_numbers = #tpu.dot_dimension_numbers<[1], [0], [0], [1], [0, 0, 1, 1], [], []>} : vector<128x4xbf16>, vector<4x128xbf16>, vector<128x128xf32> -> vector<128x128xf32>
    %45 = arith.addf %39, %44 : vector<128x128xf32>
    %46 = vector.extract_strided_slice %33 {offsets = [2, 0, 0], sizes = [8, 16, 4], strides = [1, 1, 1]} : vector<10x16x4xbf16> to vector<8x16x4xbf16>
    %47 = vector.shape_cast %46 : vector<8x16x4xbf16> to vector<128x4xbf16>
    %c7 = arith.constant 7 : index
    %c0_33 = arith.constant 0 : index
    %c0_34 = arith.constant 0 : index
    %48 = vector.load %arg5[%c7, %c0_33, %c0_34] : memref<9x4x128xbf16, #tpu.memory_space<vmem>>, vector<1x4x128xbf16>
    %49 = vector.shape_cast %48 : vector<1x4x128xbf16> to vector<4x128xbf16>
    %cst_35 = arith.constant dense<0.000000e+00> : vector<128x128xf32>
    %50 = tpu.matmul %47, %49, %cst_35 {dimension_numbers = #tpu.dot_dimension_numbers<[1], [0], [0], [1], [0, 0, 1, 1], [], []>} : vector<128x4xbf16>, vector<4x128xbf16>, vector<128x128xf32> -> vector<128x128xf32>
    %51 = arith.addf %45, %50 : vector<128x128xf32>
    %c0_36 = arith.constant 0 : index
    %c2 = arith.constant 2 : index
    %c0_37 = arith.constant 0 : index
    %52 = vector.load %arg10[%c0_36, %c2, %c0_37] : memref<10x18x4xbf16, #tpu.memory_space<vmem>>, vector<10x16x4xbf16>
    %53 = vector.extract_strided_slice %52 {offsets = [0, 0, 0], sizes = [8, 16, 4], strides = [1, 1, 1]} : vector<10x16x4xbf16> to vector<8x16x4xbf16>
    %54 = vector.shape_cast %53 : vector<8x16x4xbf16> to vector<128x4xbf16>
    %c2_38 = arith.constant 2 : index
    %c0_39 = arith.constant 0 : index
    %c0_40 = arith.constant 0 : index
    %55 = vector.load %arg5[%c2_38, %c0_39, %c0_40] : memref<9x4x128xbf16, #tpu.memory_space<vmem>>, vector<1x4x128xbf16>
    %56 = vector.shape_cast %55 : vector<1x4x128xbf16> to vector<4x128xbf16>
    %cst_41 = arith.constant dense<0.000000e+00> : vector<128x128xf32>
    %57 = tpu.matmul %54, %56, %cst_41 {dimension_numbers = #tpu.dot_dimension_numbers<[1], [0], [0], [1], [0, 0, 1, 1], [], []>} : vector<128x4xbf16>, vector<4x128xbf16>, vector<128x128xf32> -> vector<128x128xf32>
    %58 = arith.addf %51, %57 : vector<128x128xf32>
    %59 = vector.extract_strided_slice %52 {offsets = [1, 0, 0], sizes = [8, 16, 4], strides = [1, 1, 1]} : vector<10x16x4xbf16> to vector<8x16x4xbf16>
    %60 = vector.shape_cast %59 : vector<8x16x4xbf16> to vector<128x4xbf16>
    %c5 = arith.constant 5 : index
    %c0_42 = arith.constant 0 : index
    %c0_43 = arith.constant 0 : index
    %61 = vector.load %arg5[%c5, %c0_42, %c0_43] : memref<9x4x128xbf16, #tpu.memory_space<vmem>>, vector<1x4x128xbf16>
    %62 = vector.shape_cast %61 : vector<1x4x128xbf16> to vector<4x128xbf16>
    %cst_44 = arith.constant dense<0.000000e+00> : vector<128x128xf32>
    %63 = tpu.matmul %60, %62, %cst_44 {dimension_numbers = #tpu.dot_dimension_numbers<[1], [0], [0], [1], [0, 0, 1, 1], [], []>} : vector<128x4xbf16>, vector<4x128xbf16>, vector<128x128xf32> -> vector<128x128xf32>
    %64 = arith.addf %58, %63 : vector<128x128xf32>
    %65 = vector.extract_strided_slice %52 {offsets = [2, 0, 0], sizes = [8, 16, 4], strides = [1, 1, 1]} : vector<10x16x4xbf16> to vector<8x16x4xbf16>
    %66 = vector.shape_cast %65 : vector<8x16x4xbf16> to vector<128x4xbf16>
    %c8 = arith.constant 8 : index
    %c0_45 = arith.constant 0 : index
    %c0_46 = arith.constant 0 : index
    %67 = vector.load %arg5[%c8, %c0_45, %c0_46] : memref<9x4x128xbf16, #tpu.memory_space<vmem>>, vector<1x4x128xbf16>
    %68 = vector.shape_cast %67 : vector<1x4x128xbf16> to vector<4x128xbf16>
    %cst_47 = arith.constant dense<0.000000e+00> : vector<128x128xf32>
    %69 = tpu.matmul %66, %68, %cst_47 {dimension_numbers = #tpu.dot_dimension_numbers<[1], [0], [0], [1], [0, 0, 1, 1], [], []>} : vector<128x4xbf16>, vector<4x128xbf16>, vector<128x128xf32> -> vector<128x128xf32>
    %70 = arith.addf %64, %69 : vector<128x128xf32>
    %c0_48 = arith.constant 0 : index
    %c0_49 = arith.constant 0 : index
    %71 = vector.load %arg6[%c0_48, %c0_49] : memref<1x128xf32, #tpu.memory_space<vmem>>, vector<1x128xf32>
    %72 = vector.broadcast %71 : vector<1x128xf32> to vector<128x128xf32>
    %73 = arith.addf %70, %72 : vector<128x128xf32>
    %cst_50 = arith.constant 0.000000e+00 : f32
    %74 = vector.broadcast %cst_50 : f32 to vector<128x128xf32>
    %75 = arith.maximumf %73, %74 : vector<128x128xf32>
    %76 = arith.truncf %75 : vector<128x128xf32> to vector<128x128xbf16>
    %c0_51 = arith.constant 0 : index
    %c0_52 = arith.constant 0 : index
    %77 = vector.load %arg7[%c0_51, %c0_52] : memref<128x256xbf16, #tpu.memory_space<vmem>>, vector<128x256xbf16>
    %cst_53 = arith.constant dense<0.000000e+00> : vector<128x256xf32>
    %78 = tpu.matmul %76, %77, %cst_53 {dimension_numbers = #tpu.dot_dimension_numbers<[1], [0], [0], [1], [0, 0, 1, 1], [], []>} : vector<128x128xbf16>, vector<128x256xbf16>, vector<128x256xf32> -> vector<128x256xf32>
    %c0_54 = arith.constant 0 : index
    %c0_55 = arith.constant 0 : index
    %79 = vector.load %arg8[%c0_54, %c0_55] : memref<1x256xf32, #tpu.memory_space<vmem>>, vector<1x256xf32>
    %80 = vector.broadcast %79 : vector<1x256xf32> to vector<128x256xf32>
    %81 = arith.addf %78, %80 : vector<128x256xf32>
    %82 = vector.shape_cast %81 : vector<128x256xf32> to vector<8x16x256xf32>
    %c0_56 = arith.constant 0 : index
    %c0_57 = arith.constant 0 : index
    %c0_58 = arith.constant 0 : index
    %c0_59 = arith.constant 0 : index
    %83 = vector.load %arg9[%c0_56, %c0_57, %c0_58, %c0_59] : memref<1x8x16x256xf32, #tpu.memory_space<vmem>>, vector<1x8x16x256xf32>
    %84 = vector.shape_cast %83 : vector<1x8x16x256xf32> to vector<8x16x256xf32>
    %85 = vector.shape_cast %82 : vector<8x16x256xf32> to vector<1x8x16x256xf32>
    tpu.vector_store %arg9[%c0_56, %c0_57, %c0_58, %c0_59], %85 {strides = array<i32>} : memref<1x8x16x256xf32, #tpu.memory_space<vmem>>, vector<1x8x16x256xf32>,
    return
  }
  func.func @transform_0(%arg0: i32, %arg1: i32) -> (i32, i32, i32, i32) {
    %c0_i32 = arith.constant 0 : i32
    %c0_i32_0 = arith.constant 0 : i32
    %c0_i32_1 = arith.constant 0 : i32
    return %arg0, %arg1, %c0_i32, %c0_i32_0 : i32, i32, i32, i32
  }
  func.func @transform_1(%arg0: i32, %arg1: i32) -> (i32, i32, i32, i32) {
    %c8_i32 = arith.constant 8 : i32
    %0 = arith.muli %arg1, %c8_i32 : i32
    %c1_i32 = arith.constant 1 : i32
    %1 = arith.subi %0, %c1_i32 : i32
    %c0_i32 = arith.constant 0 : i32
    %2 = arith.maxsi %1, %c0_i32 : i32
    %c0_i32_0 = arith.constant 0 : i32
    %c0_i32_1 = arith.constant 0 : i32
    %c0_i32_2 = arith.constant 0 : i32
    return %arg0, %2, %c0_i32_0, %c0_i32_1 : i32, i32, i32, i32
  }
  func.func @transform_2(%arg0: i32, %arg1: i32) -> (i32, i32, i32, i32) {
    %c1_i32 = arith.constant 1 : i32
    %0 = arith.addi %arg1, %c1_i32 : i32
    %c8_i32 = arith.constant 8 : i32
    %1 = arith.muli %0, %c8_i32 : i32
    %c15_i32 = arith.constant 15 : i32
    %2 = arith.minsi %1, %c15_i32 : i32
    %c0_i32 = arith.constant 0 : i32
    %c0_i32_0 = arith.constant 0 : i32
    %c0_i32_1 = arith.constant 0 : i32
    return %arg0, %2, %c0_i32, %c0_i32_0 : i32, i32, i32, i32
  }
  func.func @transform_3(%arg0: i32, %arg1: i32) -> (i32, i32, i32) {
    %c0_i32 = arith.constant 0 : i32
    %c0_i32_0 = arith.constant 0 : i32
    %c0_i32_1 = arith.constant 0 : i32
    %c0_i32_2 = arith.constant 0 : i32
    return %c0_i32, %c0_i32_0, %c0_i32_1 : i32, i32, i32
  }
  func.func @transform_4(%arg0: i32, %arg1: i32) -> (i32, i32) {
    %c0_i32 = arith.constant 0 : i32
    %c0_i32_0 = arith.constant 0 : i32
    %c0_i32_1 = arith.constant 0 : i32
    return %c0_i32, %c0_i32_0 : i32, i32
  }
  func.func @transform_5(%arg0: i32, %arg1: i32) -> (i32, i32) {
    %c0_i32 = arith.constant 0 : i32
    %c0_i32_0 = arith.constant 0 : i32
    %c0_i32_1 = arith.constant 0 : i32
    return %c0_i32, %c0_i32_0 : i32, i32
  }
  func.func @transform_6(%arg0: i32, %arg1: i32) -> (i32, i32) {
    %c0_i32 = arith.constant 0 : i32
    %c0_i32_0 = arith.constant 0 : i32
    %c0_i32_1 = arith.constant 0 : i32
    return %c0_i32, %c0_i32_0 : i32, i32
  }
  func.func @transform_7(%arg0: i32, %arg1: i32) -> (i32, i32, i32, i32) {
    %c0_i32 = arith.constant 0 : i32
    %c0_i32_0 = arith.constant 0 : i32
    %c0_i32_1 = arith.constant 0 : i32
    return %arg0, %arg1, %c0_i32, %c0_i32_0 : i32, i32, i32, i32
  }
}

</mosaic_0001>

<bundles_post_ra>
// kernel: tpu_custom_call.1
= control target key start
LH: loop header
LB: loop body
LE: loop exit
PB: predicated region body
PF: predicated region fallthrough
CT: control target
= control target key end

     0   :  { %12 = vsyncpa [#allocation4], 0  ;;  %s3553_s0 = inlined_call_operand.vmem [shape: bf16[2,16,18,4], index: 0, kind: input, shape index: {}]   ;;  %s3554_s1 = inlined_call_operand.vmem [shape: bf16[2,16,18,4], index: 1, kind: input, shape index: {}]   ;;  %s3555_s2 = inlined_call_operand.vmem [shape: bf16[2,16,18,4], index: 2, kind: input, shape index: {}]   ;;  %s3556_s3 = inlined_call_operand.vmem [shape: bf16[9,4,128], index: 3, kind: input, shape index: {}]   ;;  %s3557_s4 = inlined_call_operand.vmem [shape: f32[1,128], index: 4, kind: input, shape index: {}]   ;;  %s3558_s5 = inlined_call_operand.vmem [shape: bf16[128,256], index: 5, kind: input, shape index: {}]   ;;  %s3559_s6 = inlined_call_operand.vmem [shape: f32[1,256], index: 6, kind: input, shape index: {}]   ;;  %s3560_s7 = inlined_call_operand.hbm [shape: f32[2,16,16,256], index: 7, kind: output, shape index: {}]  }
   0x1   :  { %14 = vsyncpa [#allocation4 + $0x1], 0  ;;  %s2640_s24 = smov 0   ;;  %s2642_s25 = smov 0  }
   0x2   :  { %s2644_s26 = smov 0   ;;  %s2646_s27 = smov 0  }
   0x3   :  { %s2648_s28 = smov 0   ;;  %s2650_s29 = smov 0  }
   0x4   :  { %s2652_s30 = smov 0   ;;  %s2654_s8 = smov 0  }
   0x5 LB: > { %3565 = sst [smem:[#allocation6_spill]] %s2590_s30  ;;  %s2150_s9 = sadd.s32 4294967295, %s2594_s8   ;;  %s2594_s8 = sphi %s2654_s8, %s20_s8   ;;  %s2590_s30 = sphi %s2652_s30, %s3578_s30   ;;  %s2586_s29 = sphi %s2650_s29, %s3583_s29   ;;  %s2582_s28 = sphi %s2648_s28, %s3576_s28   ;;  %s2578_s27 = sphi %s2646_s27, %s3582_s27   ;;  %s2574_s26 = sphi %s2644_s26, %s3581_s26   ;;  %s2570_s25 = sphi %s2642_s25, %s3580_s25   ;;  %s2566_s24 = sphi %s2640_s24, %s3579_s24  }
   0x6   : > { %s2151_s10 = sadd.s32 4294967294, %s2594_s8   ;;  %s29_s11 = sadd.s32 1, %s2586_s29 }
   0x7   : > { %p30_p0 = scmp.ge.s32.totalorder %s29_s11, 2  ;;  %s32_s12 = sadd.s32 1, %s2590_s30 }
   0x8   : > { %p235_p1 = scmp.ne.s32.totalorder %s2574_s26, %s2570_s25  ;;  %p236_p2 = scmp.eq.s32.totalorder %s2150_s9, 3 }
   0x9   : > { %s3585_s11 = smov (%p30_p0, %s29_s11), 0  ;;  %s3587_s12 = smov (!%p30_p0, %s32_s12), %s2590_s30 }
   0xa   : > { %3566 = sst [smem:[#allocation7_spill]] %s3585_s11  ;;  %s221_s13 = ssub.s32 %s2586_s29, %s3585_s11 }
   0xb   : > { %p2691_p3 = por %p236_p2, %p235_p1  ;;  %p34_p4 = scmp.ge.s32.totalorder %s3587_s12, 2 }
   0xc   : > { %p241_p5 = scmp.ne.s32.totalorder %s2570_s25, %s2566_s24  ;;  %p242_p6 = scmp.eq.s32.totalorder %s2151_s10, 3 }
   0xd   : > { %p2160_p7 = scmp.ge.s32.totalorder %s2594_s8, 1  ;;  %s3589_s12 = smov (%p34_p4, %s3587_s12), 0 }
   0xe   : > { %3568 = sst [smem:[#allocation8_spill]] %s3589_s12  ;;  %p2700_p8 = por %p242_p6, %p241_p5 }
   0xf   : > { %p326_p9 = scmp.lt.s32.totalorder %s2594_s8, 5  ;;  %s220_s16 = ssub.s32 %s2590_s30, %s3589_s12 }
  0x10   : > { %s225_s17 = sadd.s32 1, %s2574_s26  ;;  %s222_s18 = sor.u32 %s221_s13, %s220_s16 }
  0x11   : > { %p327_p10 = pnand %p2160_p7, %p326_p9  ;;  %p223_p11 = scmp.eq.s32.totalorder %s222_s18, 0 }
  0x12   : > { %s3562_s20 = sand.u32 (!%p327_p10), 1, %s2570_s25   ;;  %s2162_s21 = sshll.u32 (!%p327_p10), %s2578_s27, 3 }
  0x13   : > { %s2709_s19 = scalar_select %p223_p11, %s2574_s26, %s225_s17  }
  0x14   : > { %330 = sbr.rel (%p327_p10) target bundleno = 732 (0x2dc), region = 48  ;;  %s2715_s22 = sshll.u32 (!%p327_p10), %s3562_s20, 8 }
  0x15   : > { %p390_p12 = scmp.lt.s32.totalorder (!%p327_p10), %s2582_s28, 1  ;;  %p392_p13 = scmp.lt.s32.totalorder (!%p327_p10), %s2162_s21, 15 }
  0x16   : > { %s2165_s13 = sadd.s32 (!%p327_p10), 4294967295, %s2162_s21  ;;  %s2389_s17 = sadd.s32 (!%p327_p10), 8, %s2162_s21 }
  0x17   : > { %p402_p0 = scmp.gt.s32.totalorder (!%p327_p10), %s2165_s13, 0  ;;  %p2722_p1 = scmp.lt.s32.totalorder (!%p327_p10), %s2389_s17, 15 }
  0x18   : > { %p2166_p2 = scmp.lt.s32.totalorder (!%p327_p10), %s2165_s13, 15  ;;  %p2177_p4 = scmp.ne.s32.totalorder (!%p327_p10), %s2578_s27, 0 }
  0x19   : > { %s391_s23 = scalar_select %p390_p12, %s2582_s28, 1  ;;  %vm461_vm0 = vcmask 27648   ;;  %vm464_vm1 = vcmask 24576  }
  0x1a   : > { %s393_s9 = scalar_select %p392_p13, %s2162_s21, 15 }
  0x1b   : > { %s2719_s10 = smul.u32 48, %s391_s23  ;;  %s3591_s13 = smov (!%p402_p0, %s2165_s13), 0 }
  0x1c   : > { %s2420_s16 = smul.u32 3, %s393_s9  ;;  %s3593_s17 = smov (!%p2722_p1, %s2389_s17), 15 }
  0x1d   : > { %s3595_s13 = smov (!%p2166_p2, %s3591_s13), 15  ;;  %s3597_s17 = smov (!%p2722_p1, %s3593_s17), 15 }
  0x1e   : > { %s396_s18 = sadd.s32 %s2719_s10, %s2420_s16  ;;  %s2422_s30 = smul.u32 3, %s3595_s13 }
  0x1f   : > { %s2163_s20 = sshll.u32 %s396_s18, 2  ;;  %s2423_s11 = smul.u32 3, %s3597_s17 }
  0x20   : > { %s2729_s23 = scalar_lea.vmem %s3553_s0, %s2163_s20  ;;  %s410_s20 = sadd.s32 %s2422_s30, %s2719_s10 }
  0x21   : > { %v436_v0 = vld [vmem:[%s2729_s23] sm:$0xf]  ;;  %v437_v1 = vld [vmem:[%s2729_s23 + $0x4] sm:$0xf]  ;;  %v438_v2 = vld [vmem:[%s2729_s23 + $0x8] sm:$0x1]  ;;  %s427_s21 = sadd.s32 %s2423_s11, %s2719_s10 }
  0x22   : > { %462 = vst.msk [vmem:[#allocation2 + $0xc] sm:$0xf] %vm461_vm0, %v436_v0  ;;  %v439_v3 = vld [vmem:[%s2729_s23 + $0xc] sm:$0xf]  ;;  %v440_v4 = vld [vmem:[%s2729_s23 + $0x10] sm:$0xf] }
  0x23   : > { %463 = vst.msk [vmem:[#allocation2 + $0x10] sm:$0xf] %vm461_vm0, %v437_v1  ;;  %v441_v5 = vld [vmem:[%s2729_s23 + $0x14] sm:$0x1]  ;;  %v442_v6 = vld [vmem:[%s2729_s23 + $0x18] sm:$0xf] }
  0x24   : > { %465 = vst.msk [vmem:[#allocation2 + $0x14] sm:$0x1] %vm464_vm1, %v438_v2  ;;  %v443_v7 = vld [vmem:[%s2729_s23 + $0x1c] sm:$0xf]  ;;  %v444_v8 = vld [vmem:[%s2729_s23 + $0x20] sm:$0x1] }
  0x25   : > { %466 = vst.msk [vmem:[#allocation2 + $0x18] sm:$0xf] %vm461_vm0, %v439_v3  ;;  %s2171_s12 = sshll.u32 %s410_s20, 2  ;;  %v445_v9 = vld [vmem:[%s2729_s23 + $0x24] sm:$0xf]  ;;  %s2176_s17 = sshll.u32 %s427_s21, 2 }
  0x26   : > { %467 = vst.msk [vmem:[#allocation2 + $0x1c] sm:$0xf] %vm461_vm0, %v440_v4  ;;  %s2757_s16 = scalar_lea.vmem %s3554_s1, %s2171_s12  ;;  %v446_v10 = vld [vmem:[%s2729_s23 + $0x28] sm:$0xf]  ;;  %s2764_s20 = scalar_lea.vmem %s3555_s2, %s2176_s17  ;;  %v447_v11 = vld [vmem:[%s2729_s23 + $0x2c] sm:$0x1] }
  0x27   : > { %468 = vst.msk [vmem:[#allocation2 + $0x20] sm:$0x1] %vm464_vm1, %v441_v5  ;;  %v448_v12 = vld [vmem:[%s2729_s23 + $0x30] sm:$0xf]  ;;  %v449_v13 = vld [vmem:[%s2729_s23 + $0x34] sm:$0xf] }
  0x28   : > { %469 = vst.msk [vmem:[#allocation2 + $0x24] sm:$0xf] %vm461_vm0, %v442_v6  ;;  %v450_v14 = vld [vmem:[%s2729_s23 + $0x38] sm:$0x1]  ;;  %v451_v15 = vld [vmem:[%s2729_s23 + $0x3c] sm:$0xf] }
  0x29   : > { %470 = vst.msk [vmem:[#allocation2 + $0x28] sm:$0xf] %vm461_vm0, %v443_v7  ;;  %v452_v16 = vld [vmem:[%s2729_s23 + $0x40] sm:$0xf]  ;;  %v453_v17 = vld [vmem:[%s2729_s23 + $0x44] sm:$0x1] }
  0x2a   : > { %471 = vst.msk [vmem:[#allocation2 + $0x2c] sm:$0x1] %vm464_vm1, %v444_v8  ;;  %v454_v18 = vld [vmem:[%s2729_s23 + $0x48] sm:$0xf]  ;;  %v455_v19 = vld [vmem:[%s2729_s23 + $0x4c] sm:$0xf] }
  0x2b   : > { %472 = vst.msk [vmem:[#allocation2 + $0x30] sm:$0xf] %vm461_vm0, %v445_v9  ;;  %v456_v20 = vld [vmem:[%s2729_s23 + $0x50] sm:$0x1]  ;;  %v457_v21 = vld [vmem:[%s2729_s23 + $0x54] sm:$0xf] }
  0x2c   : > { %473 = vst.msk [vmem:[#allocation2 + $0x34] sm:$0xf] %vm461_vm0, %v446_v10  ;;  %v458_v22 = vld [vmem:[%s2729_s23 + $0x58] sm:$0xf]  ;;  %v459_v23 = vld [vmem:[%s2729_s23 + $0x5c] sm:$0x1] }
  0x2d   : > { %474 = vst.msk [vmem:[#allocation2 + $0x38] sm:$0x1] %vm464_vm1, %v447_v11  ;;  %s2796_s10 = scalar_lea.vmem [#allocation3], %s2715_s22 }
  0x2e   : > { %475 = vst.msk [vmem:[#allocation2 + $0x3c] sm:$0xf] %vm461_vm0, %v448_v12 }
  0x2f   : > { %476 = vst.msk [vmem:[#allocation2 + $0x40] sm:$0xf] %vm461_vm0, %v449_v13 }
  0x30   : > { %477 = vst.msk [vmem:[#allocation2 + $0x44] sm:$0x1] %vm464_vm1, %v450_v14 }
  0x31   : > { %478 = vst.msk [vmem:[#allocation2 + $0x48] sm:$0xf] %vm461_vm0, %v451_v15 }
  0x32   : > { %479 = vst.msk [vmem:[#allocation2 + $0x4c] sm:$0xf] %vm461_vm0, %v452_v16 }
  0x33   : > { %480 = vst.msk [vmem:[#allocation2 + $0x50] sm:$0x1] %vm464_vm1, %v453_v17 }
  0x34   : > { %481 = vst.msk [vmem:[#allocation2 + $0x54] sm:$0xf] %vm461_vm0, %v454_v18 }
  0x35   : > { %482 = vst.msk [vmem:[#allocation2 + $0x58] sm:$0xf] %vm461_vm0, %v455_v19  ;;  %490 = sbr.rel (%p2177_p4) target bundleno = 62 (0x3e), region = 52 }
  0x36   : > { %483 = vst.msk [vmem:[#allocation2 + $0x5c] sm:$0x1] %vm464_vm1, %v456_v20 }
  0x37   : > { %484 = vst.msk [vmem:[#allocation2 + $0x60] sm:$0xf] %vm461_vm0, %v457_v21 }
  0x38   : > { %485 = vst.msk [vmem:[#allocation2 + $0x64] sm:$0xf] %vm461_vm0, %v458_v22 }
  0x39   : > { %486 = vst.msk [vmem:[#allocation2 + $0x68] sm:$0x1] %vm464_vm1, %v459_v23 }
  0x3a   : > { %v2596_v24 = vmov 0  }
  0x3b   : > { %491 = vst.msk [vmem:[#allocation2] sm:$0xf] %vm461_vm0, %v2596_v24 }
  0x3c   : > { %492 = vst.msk [vmem:[#allocation2 + $0x4] sm:$0xf] %vm461_vm0, %v2596_v24 }
  0x3d   : > { %493 = vst.msk [vmem:[#allocation2 + $0x8] sm:$0x1] %vm464_vm1, %v2596_v24 }
  0x3e PF: > { %p2178_p5 = scmp.le.s32.totalorder %s2578_s27, 0 }
  0x40   : > { %497 = sbr.rel (%p2178_p5) target bundleno = 73 (0x49), region = 56 }
  0x45   : > { %v498_v25 = vld [vmem:[%s2757_s16] sm:$0xf]  ;;  %v499_v26 = vld [vmem:[%s2757_s16 + $0x4] sm:$0xf]  ;;  %v500_v27 = vld [vmem:[%s2757_s16 + $0x8] sm:$0x1] }
  0x46   : > { %501 = vst.msk [vmem:[#allocation2] sm:$0xf] %vm461_vm0, %v498_v25 }
  0x47   : > { %502 = vst.msk [vmem:[#allocation2 + $0x4] sm:$0xf] %vm461_vm0, %v499_v26 }
  0x48   : > { %503 = vst.msk [vmem:[#allocation2 + $0x8] sm:$0x1] %vm464_vm1, %v500_v27 }
  0x49 PF: > { %p2179_p6 = scmp.ne.s32.totalorder %s2578_s27, 1 }
  0x4b   : > { %507 = sbr.rel (%p2179_p6) target bundleno = 84 (0x54), region = 60 }
  0x50   : > { %v2597_v28 = vmov 0  }
  0x51   : > { %509 = vst.msk [vmem:[#allocation2 + $0x6c] sm:$0xf] %vm461_vm0, %v2597_v28 }
  0x52   : > { %510 = vst.msk [vmem:[#allocation2 + $0x70] sm:$0xf] %vm461_vm0, %v2597_v28 }
  0x53   : > { %511 = vst.msk [vmem:[#allocation2 + $0x74] sm:$0x1] %vm464_vm1, %v2597_v28 }
  0x54 PF: > { %p2180_p7 = scmp.ge.s32.totalorder %s2578_s27, 1 }
  0x56   : > { %515 = sbr.rel (%p2180_p7) target bundleno = 95 (0x5f), region = 64 }
  0x5b   : > { %v516_v29 = vld [vmem:[%s2764_s20] sm:$0xf]  ;;  %v517_v30 = vld [vmem:[%s2764_s20 + $0x4] sm:$0xf]  ;;  %v518_v31 = vld [vmem:[%s2764_s20 + $0x8] sm:$0x1] }
  0x5c   : > { %520 = vst.msk [vmem:[#allocation2 + $0x6c] sm:$0xf] %vm461_vm0, %v516_v29 }
  0x5d   : > { %521 = vst.msk [vmem:[#allocation2 + $0x70] sm:$0xf] %vm461_vm0, %v517_v30 }
  0x5e   : > { %522 = vst.msk [vmem:[#allocation2 + $0x74] sm:$0x1] %vm464_vm1, %v518_v31 }
  0x5f PF: > { %v2181_v32 = vld [vmem:[%s3556_s3 + $0x6] sm:$0x3]  ;;  %vm611_vm2 = vcmask 1041408   ;;  %v543_v33 = vld [vmem:[%s3556_s3] sm:$0x3]  ;;  %v2391_v37 = vld [vmem:[#allocation2 + $0xc] sm:$0xff] }
  0x60   : > { %v613_v34 = vsel %vm611_vm2, %v2181_v32, 0  ;;  %v673_v35 = vsel %vm611_vm2, %v543_v33, 0  ;;  %v2234_v36 = vld [vmem:[%s3556_s3 + $0xc] sm:$0x3]  ;;  %v2831_v38 = vld [vmem:[#allocation2 + $0x54] sm:$0xff]  ;;  %vm586_vm3 = vcmask 31744  }
  0x61   : > { %622 = vmatpush.bf16.msra.mxu0 %v613_v34  ;;  %2417 = vmatpush.bf16.msra.mxu3 %v613_v34  ;;  %v735_v39 = vsel %vm611_vm2, %v2234_v36, 0  ;;  %v2390_v40 = vld [vmem:[#allocation2] sm:$0xff]  ;;  %v2392_v41 = vld [vmem:[#allocation2 + $0x18] sm:$0xff]  ;;  %v2256_v42 = vld [vmem:[%s3556_s3 + $0x8] sm:$0x3]  ;;  %vm1379_vm6 = vcmask 1042432  }
  0x62   : > { %682 = vmatpush.bf16.msra.mxu1 %v673_v35  ;;  %744 = vmatpush.bf16.msra.mxu2 %v735_v39  ;;  %v1178_v43 = vsel %vm611_vm2, %v2256_v42, 0  ;;  %v2398_v44 = vld [vmem:[#allocation2 + $0x60] sm:$0xff]  ;;  %v2847_v46 = vld [vmem:[#allocation2 + $0x48] sm:$0xff]  ;;  %v2394_v47 = vld [vmem:[#allocation2 + $0x30] sm:$0xff]  ;;  %vm832_vm4 = vsmask.f32 3328 }
  0x63   : > { %v2393_v45 = vld [vmem:[#allocation2 + $0x24] sm:$0xff]  ;;  %v2247_v48 = vld [vmem:[%s3556_s3 + $0x2] sm:$0x3]  ;;  %v805_v55 = vld [vmem:[#allocation2 + $0xc] sm:$0xf]  ;;  %vm1380_vm7 = vcmask 1046532  }
  0x64   : > { %2214 = vmatmul.msk.bf16.vlgmr.msra.gmra.mxu0 %vm586_vm3, %v2391_v37  ;;  %2220 = vmatmul.msk.bf16.vlgmr.msra.gmra.mxu3 %vm586_vm3, %v2831_v38  ;;  %v1078_v49 = vsel %vm611_vm2, %v2247_v48, 0  ;;  %v2858_v50 = vld [vmem:[#allocation2 + $0x3c] sm:$0xff]  ;;  %v2866_v52 = vld [vmem:[#allocation2 + $0x4] sm:$0xf]  ;;  %v2871_v56 = vld [vmem:[#allocation2 + $0x10] sm:$0xf] }
  0x65   : > { %2418 = vmatpush.bf16.msrb.mxu3 %v673_v35  ;;  %1187 = vmatpush.bf16.msrb.mxu0 %v1178_v43  ;;  %v802_v51 = vld [vmem:[#allocation2] sm:$0xf]  ;;  %v2292_v57 = vld [vmem:[%s3556_s3 + $0xa] sm:$0x3]  ;;  %v2282_v58 = vld [vmem:[%s3556_s3 + $0x4] sm:$0x3] }
  0x66   : > { %2226 = vmatmul.msk.bf16.vlgmr.msra.gmra.mxu1 %vm586_vm3, %v2390_v40  ;;  %2239 = vmatmul.msk.bf16.vlgmr.msra.gmra.mxu2 %vm586_vm3, %v2392_v41  ;;  %v836_v53 = vshrl.u32 %v802_v51, 16  ;;  %v839_v54 = vshll.u32 %v802_v51, 16  ;;  %v1575_v59 = vsel %vm611_vm2, %v2292_v57, 0  ;;  %v1489_v60 = vsel %vm611_vm2, %v2282_v58, 0  ;;  %v2265_v61 = vld [vmem:[%s3556_s3 + $0xe] sm:$0x3]  ;;  %vm2921_vm9 = vmor %vm1379_vm6, %vm1380_vm7 }
  0x67   : > { %v808_v62 = vld [vmem:[#allocation2 + $0x18] sm:$0xf]  ;;  %v845_v63 = vshll.u32 %v2866_v52, 16  ;;  %1498 = vmatpush.bf16.msrb.mxu2 %v1489_v60  ;;  %v1278_v0 = vsel %vm611_vm2, %v2265_v61, 0  ;;  %v2302_v1 = vld [vmem:[%s3556_s3 + $0x10] sm:$0x3] }
  0x68   : > { %v2892_v2 = vld [vmem:[#allocation2 + $0x1c] sm:$0xf]  ;;  %v849_v3 = vshrl.u32 %v2866_v52, 16  ;;  %v860_v4 = vshrl.u32 %v805_v55, 16  ;;  %v863_v5 = vshll.u32 %v805_v55, 16  ;;  %1287 = vmatpush.bf16.msrb.mxu1 %v1278_v0  ;;  %v1661_v6 = vsel %vm611_vm2, %v2302_v1, 0 }
  0x69   : > { %2419 = vmatpush.bf16.msra.mxu3 %v735_v39  ;;  %v869_v7 = vshll.u32 %v2871_v56, 16  ;;  %v873_v8 = vshrl.u32 %v2871_v56, 16  ;;  %1670 = vmatpush.bf16.msra.mxu0 %v1661_v6  ;;  %v884_v9 = vshrl.u32 %v808_v62, 16  ;;  %v887_v10 = vshll.u32 %v808_v62, 16  ;;  %v804_v15 = vld [vmem:[#allocation2 + $0x8] sm:$0x1] }
  0x6a   : > { %v893_v11 = vshll.u32 %v2892_v2, 16  ;;  %v897_v12 = vshrl.u32 %v2892_v2, 16  ;;  %v838_v13 = vrot.slane %v836_v53, 4  ;;  %v841_v14 = vrot.slane %v839_v54, 5  ;;  %v2900_v22 = vld [vmem:[#allocation2 + $0x14] sm:$0x1] }
  0x6b   : > { %v847_v16 = vrot.slane %v845_v63, 5  ;;  %v851_v17 = vrot.slane %v849_v3, 4  ;;  %v862_v18 = vrot.slane %v860_v4, 4  ;;  %v865_v19 = vrot.slane %v863_v5, 5  ;;  %v2902_v29 = vld [vmem:[#allocation2 + $0x20] sm:$0x1] }
  0x6c   : > { %v871_v20 = vrot.slane %v869_v7, 5  ;;  %v875_v21 = vrot.slane %v873_v8, 4  ;;  %v886_v23 = vrot.slane %v884_v9, 4  ;;  %v889_v24 = vrot.slane %v887_v10, 5  ;;  %v2399_v32 = vld [vmem:[#allocation2 + $0x6c] sm:$0xff]  ;;  %s2416_s11 = sshll.u32 %s2578_s27, 5 }
  0x6d   : > { %v895_v25 = vrot.slane %v893_v11, 5  ;;  %v899_v26 = vrot.slane %v897_v12, 4  ;;  %v842_v27 = vor.u32 %v841_v14, %v838_v13  ;;  %v855_v28 = vshll.u32 %v804_v15, 16  ;;  %v1345_v36 = vld [vmem:[#allocation2] sm:$0xe]  ;;  %s2378_s12 = sshll.u32 %s2582_s28, 6 }
  0x6e   : > { %v852_v30 = vor.u32 %v851_v17, %v847_v16  ;;  %v866_v31 = vor.u32 %v865_v19, %v862_v18  ;;  %v876_v33 = vor.u32 %v875_v21, %v871_v20  ;;  %v879_v34 = vshll.u32 %v2900_v22, 16  ;;  %v811_v57 = vld [vmem:[#allocation2 + $0x24] sm:$0xf]  ;;  %v2945_v18 = vld [vmem:[#allocation2 + $0x2c] sm:$0x1]  ;;  %s2017_s21 = sadd.s32 %s2416_s11, %s2378_s12  ;;  %s2020_s27 = sshll.u32 %s2796_s10, 4  ;;  %s2021_s27 = int_to_ptr.vmem [resolvable:$true] %s2020_s27 }
  0x6f   : > { %v1384_v35 = vrot.slane %v2866_v52, 5  ;;  %v900_v39 = vor.u32 %v899_v26, %v895_v25  ;;  %v903_v40 = vshll.u32 %v2902_v29, 16  ;;  %vm833_vm5 = vsmask.f32 7440  ;;  %s2379_s9 = sshll.u32 %s2017_s21, 3  ;;  %s3575_s18 = sand.u32 1, %s2570_s25  }
  0x70   : > { %v857_v42 = vrot.slane %v855_v28, 5  ;;  %v853_v43 = vrot.slane %v852_v30, 4  ;;  %v2274_v48 = vrot.slane %v1345_v36, 9  ;;  %vm2916_vm8 = vmor %vm832_vm4, %vm833_vm5  ;;  %v1387_v52 = vrot.slane %v804_v15, 5  ;;  %s2019_s17 = scalar_lea.hbm %s3560_s7, %s2379_s9  ;;  %s2005_s30 = scalar_lea.sflag [#allocation4], %s3575_s18 }
  0x71   : > { %v901_v53 = vrot.slane %v900_v39, 4  ;;  %v905_v54 = vrot.slane %v903_v40, 5  ;;  %v908_v1 = vshrl.u32 %v811_v57, 16  ;;  %v911_v3 = vshll.u32 %v811_v57, 16  ;;  %v2969_v57 = vld [vmem:[#allocation2 + $0x38] sm:$0x1] }
  0x72   : > { %v858_v58 = vsel %vm2916_vm8, %v853_v43, %v857_v42  ;;  %v1385_v61 = vsel %vm2921_vm9, %v2274_v48, %v1384_v35  ;;  %v927_v28 = vshll.u32 %v2945_v18, 16  ;;  %s2022_s28 = sshll.u32 %s2019_s17, 4  ;;  %s2520_s12 = scalar_lea.hbm %s3560_s7, 1024  ;;  %s2023_s28 = int_to_ptr.hbm [resolvable:$true] %s2022_s28 }
  0x73   : > { %v906_v0 = vsel %vm2916_vm8, %v901_v53, %v905_v54  ;;  %v1030_v7 = vunpack.c.l.b16 %v858_v58  ;;  %v1440_v10 = vunpack.c.l.b16 %v1385_v61  ;;  %v910_v14 = vrot.slane %v908_v1, 4  ;;  %v1347_v58 = vld [vmem:[#allocation2 + $0x18] sm:$0xe]  ;;  %s2514_s20 = sshra.s32 %s2023_s28, 4  ;;  %s2515_s20 = int_to_ptr.hbm [resolvable:$true] %s2514_s20 }
  0x74   : > { %2215 = vmatmul.msk.bf16.gmra.mxu0 %vm586_vm3, %v2392_v41  ;;  %2221 = vmatmul.msk.bf16.gmra.mxu3 %vm586_vm3, %v2398_v44  ;;  %v1034_v13 = vunpack.c.l.b16 %v906_v0  ;;  %v913_v15 = vrot.slane %v911_v3, 5  ;;  %v929_v36 = vrot.slane %v927_v28, 5  ;;  %v951_v61 = vshll.u32 %v2969_v57, 16  ;;  %s2516_s22 = scalar_lea.hbm %s2515_s20, 256  ;;  %p2521_p12 = scmp.lt.s32.totalorder %s2515_s20, %s3560_s7 }
  0x75   : > { %v2276_v0 = vrot.slane %v1347_v58, 9  ;;  %v1401_v3 = vrot.slane %v2902_v29, 5  ;;  %p2517_p9 = scmp.ne.s32.totalorder %s2515_s20, %s2516_s22  ;;  %p2522_p13 = scmp.lt.s32.totalorder %s2520_s12, %s2516_s22 }
  0x76   : > { %2227 = vmatmul.msk.bf16.gmra.mxu1 %vm586_vm3, %v2391_v37  ;;  %2240 = vmatmul.msk.bf16.gmra.mxu2 %vm586_vm3, %v2393_v45  ;;  %v890_v37 = vor.u32 %v889_v24, %v886_v23  ;;  %v1391_v24 = vrot.slane %v2871_v56, 5  ;;  %v914_v26 = vor.u32 %v913_v15, %v910_v14  ;;  %v1394_v56 = vrot.slane %v2900_v22, 5 }
  0x77   : > { %p2518_p10 = pnand %p2517_p9, %p2691_p3  ;;  %p2523_p0 = por %p2522_p13, %p2521_p12 }
  0x79   : > { %p2519_p11 = pneg %p2518_p10 }
  0x7b   : > { %p2524_p1 = pnand %p2523_p0, %p2519_p11 }
  0x84   : > { %2216 = vmatmul.msk.bf16.gmra.mxu0 %vm586_vm3, %v2393_v45  ;;  %2232 = vmatmul.msk.bf16.vlgmr.msrb.gmra.mxu3 %vm586_vm3, %v2847_v46 }
  0x85   : > { %1087 = vmatpush.bf16.msrb.mxu3 %v1078_v49  ;;  %v1386_v49 = vrot.slane %v1384_v35, 4 }
  0x86   : > { %2228 = vmatmul.msk.bf16.gmra.mxu1 %vm586_vm3, %v2392_v41  ;;  %2241 = vmatmul.msk.bf16.gmra.mxu2 %vm586_vm3, %v2394_v47  ;;  %v843_v41 = vrot.slane %v842_v27, 4 }
  0x87   : > { %v1388_v62 = vsel %vm2921_vm9, %v1386_v49, %v1387_v52 }
  0x88   : > { %v1441_v11 = vunpack.c.l.b16 %v1388_v62 }
  0x8a   : > { %v1456_v21 = vpack.c.b16 %v1441_v11, %v1440_v10 }
  0x94   : > { %2217 = vmatmul.msk.bf16.gmra.mxu0 %vm586_vm3, %v2394_v47  ;;  %2233 = vmatmul.msk.bf16.gmra.mxu3 %vm586_vm3, %v2831_v38 }
  0x96   : > { %2229 = vmatmul.msk.bf16.gmra.mxu1 %vm586_vm3, %v2393_v45  ;;  %2242 = vmatmul.msk.bf16.gmra.mxu2 %vm586_vm3, %v2858_v50  ;;  %v877_v45 = vrot.slane %v876_v33, 4  ;;  %v2956_v33 = vld [vmem:[#allocation2 + $0x34] sm:$0xf] }
  0x97   : > { %v941_v40 = vshll.u32 %v2956_v33, 16 }
  0x99   : > { %v943_v48 = vrot.slane %v941_v40, 5 }
  0xa4   : > { %2218 = vmatmul.msk.bf16.gmra.mxu0 %vm586_vm3, %v2858_v50  ;;  %2245 = vmatmul.msk.bf16.vlgmr.msra.gmra.mxu3 %vm586_vm3, %v2398_v44  ;;  %v867_v44 = vrot.slane %v866_v31, 4  ;;  %v1393_v31 = vrot.slane %v1391_v24, 4 }
  0xa5   : > { %1584 = vmatpush.bf16.msra.mxu3 %v1575_v59 }
  0xa6   : > { %2230 = vmatmul.msk.bf16.gmra.mxu1 %vm586_vm3, %v2394_v47  ;;  %2243 = vmatmul.msk.bf16.gmra.mxu2 %vm586_vm3, %v2847_v46  ;;  %v881_v47 = vrot.slane %v879_v34, 5  ;;  %v872_v59 = vsel %vm2916_vm8, %v867_v44, %v871_v20  ;;  %v915_v34 = vrot.slane %v914_v26, 4  ;;  %v1395_v43 = vsel %vm2921_vm9, %v1393_v31, %v1394_v56  ;;  %v2997_v26 = vld [vmem:[#allocation2 + $0x44] sm:$0x1] }
  0xa7   : > { %v1031_v8 = vunpack.c.l.b16 %v872_v59 }
  0xa8   : > { %v882_v60 = vsel %vm2916_vm8, %v877_v45, %v881_v47 }
  0xa9   : > { %v1032_v9 = vunpack.c.l.b16 %v882_v60 }
  0xab   : > { %v1046_v20 = vpack.c.b16 %v1032_v9, %v1031_v8 }
  0xb4   : > { %2219 = vmatmul.msk.bf16.gmra.mxu0 %vm586_vm3, %v2847_v46  ;;  %2246 = vmatmul.msk.bf16.gmra.mxu3 %vm586_vm3, %v2399_v32  ;;  %v891_v46 = vrot.slane %v890_v37, 4  ;;  %v814_v32 = vld [vmem:[#allocation2 + $0x30] sm:$0xf] }
  0xb5   : > { %v932_v37 = vshrl.u32 %v814_v32, 16  ;;  %v935_v39 = vshll.u32 %v814_v32, 16  ;;  %v1348_v32 = vld [vmem:[#allocation2 + $0x24] sm:$0xe] }
  0xb6   : > { %2231 = vmatmul.msk.bf16.gmra.mxu1 %vm586_vm3, %v2858_v50  ;;  %2244 = vmatmul.msk.bf16.gmra.mxu2 %vm586_vm3, %v2831_v38  ;;  %v2925_v50 = vld [vmem:[#allocation2 + $0x28] sm:$0xf]  ;;  %v848_v38 = vsel %vm2916_vm8, %v843_v41, %v847_v16  ;;  %v896_v63 = vsel %vm2916_vm8, %v891_v46, %v895_v25  ;;  %v1346_v25 = vld [vmem:[#allocation2 + $0xc] sm:$0xe]  ;;  %v945_v41 = vshrl.u32 %v2956_v33, 16  ;;  %v1443_v46 = vunpack.c.l.b16 %v1395_v43 }
  0xb7   : > { %v917_v4 = vshll.u32 %v2925_v50, 16  ;;  %v921_v5 = vshrl.u32 %v2925_v50, 16  ;;  %v1029_v6 = vunpack.c.l.b16 %v848_v38  ;;  %v1033_v12 = vunpack.c.l.b16 %v896_v63 }
  0xb8   : > { %v2275_v30 = vrot.slane %v1346_v25, 9  ;;  %v934_v45 = vrot.slane %v932_v37, 4  ;;  %v937_v47 = vrot.slane %v935_v39, 5  ;;  %v947_v49 = vrot.slane %v945_v41, 4 }
  0xb9   : > { %v919_v16 = vrot.slane %v917_v4, 5  ;;  %v923_v17 = vrot.slane %v921_v5, 4  ;;  %v1045_v19 = vpack.c.b16 %v1030_v7, %v1029_v6  ;;  %v2947_v23 = vpack.c.b16 %v1034_v13, %v1033_v12  ;;  %v817_v6 = vld [vmem:[#allocation2 + $0x3c] sm:$0xf]  ;;  %v2985_v7 = vld [vmem:[#allocation2 + $0x40] sm:$0xf] }
  0xba   : > { %v1392_v42 = vsel %vm2921_vm9, %v2275_v30, %v1391_v24  ;;  %v1398_v38 = vrot.slane %v2892_v2, 5  ;;  %v938_v59 = vor.u32 %v937_v47, %v934_v45  ;;  %v948_v60 = vor.u32 %v947_v49, %v943_v48 }
  0xbb   : > { %v924_v27 = vor.u32 %v923_v17, %v919_v16  ;;  %v920_v44 = vsel %vm2916_vm8, %v915_v34, %v919_v16  ;;  %v1442_v52 = vunpack.c.l.b16 %v1392_v42  ;;  %v953_v5 = vrot.slane %v951_v61, 5 }
  0xbc   : > { %v1035_v53 = vunpack.c.l.b16 %v920_v44  ;;  %v1400_v1 = vrot.slane %v1398_v38, 4  ;;  %v939_v4 = vrot.slane %v938_v59, 4  ;;  %v949_v2 = vrot.slane %v948_v60, 4 }
  0xbd   : > { %v925_v35 = vrot.slane %v924_v27, 4  ;;  %v2973_v62 = vpack.c.b16 %v1443_v46, %v1442_v52  ;;  %v1399_v8 = vsel %vm2921_vm9, %v2276_v0, %v1398_v38  ;;  %v956_v11 = vshrl.u32 %v817_v6, 16 }
  0xbe   : > { %v1402_v9 = vsel %vm2921_vm9, %v1400_v1, %v1401_v3  ;;  %v944_v29 = vsel %vm2916_vm8, %v939_v4, %v943_v48  ;;  %v954_v10 = vsel %vm2916_vm8, %v949_v2, %v953_v5  ;;  %v959_v12 = vshll.u32 %v817_v6, 16 }
  0xbf   : > { %v930_v22 = vsel %vm2916_vm8, %v925_v35, %v929_v36  ;;  %v965_v13 = vshll.u32 %v2985_v7, 16  ;;  %v969_v14 = vshrl.u32 %v2985_v7, 16  ;;  %v1444_v15 = vunpack.c.l.b16 %v1399_v8 }
  0xc0   : > { %v1036_v54 = vunpack.c.l.b16 %v930_v22  ;;  %v1445_v16 = vunpack.c.l.b16 %v1402_v9  ;;  %v1037_v17 = vunpack.c.l.b16 %v944_v29  ;;  %v1405_v28 = vrot.slane %v2925_v50, 5  ;;  %v820_v22 = vld [vmem:[#allocation2 + $0x48] sm:$0xf]  ;;  %v3032_v9 = vld [vmem:[#allocation2 + $0x50] sm:$0x1] }
  0xc1   : > { %v967_v24 = vrot.slane %v965_v13, 5  ;;  %v971_v25 = vrot.slane %v969_v14, 4  ;;  %v975_v35 = vshll.u32 %v2997_v26, 16  ;;  %v2277_v39 = vrot.slane %v1348_v32, 9 }
  0xc2   : > { %v2975_v63 = vpack.c.b16 %v1036_v54, %v1035_v53  ;;  %v2999_v27 = vpack.c.b16 %v1445_v16, %v1444_v15  ;;  %v1407_v40 = vrot.slane %v1405_v28, 4  ;;  %v1408_v50 = vrot.slane %v2945_v18, 5  ;;  %v1349_v16 = vld [vmem:[#allocation2 + $0x30] sm:$0xe] }
  0xc3   : > { %v972_v34 = vor.u32 %v971_v25, %v967_v24  ;;  %v977_v43 = vrot.slane %v975_v35, 5  ;;  %v1406_v47 = vsel %vm2921_vm9, %v2277_v39, %v1405_v28  ;;  %v980_v54 = vshrl.u32 %v820_v22, 16  ;;  %v823_v25 = vld [vmem:[#allocation2 + $0x54] sm:$0xf]  ;;  %v3050_v28 = vld [vmem:[#allocation2 + $0x58] sm:$0xf] }
  0xc4   : > { %2248 = vmatmul.msk.bf16.vlgmr.msrb.gmra.mxu3 %vm586_vm3, %v1045_v19  ;;  %2257 = vmatmul.msk.bf16.vlgmr.msrb.gmra.mxu0 %vm586_vm3, %v1046_v20  ;;  %v1038_v19 = vunpack.c.l.b16 %v954_v10  ;;  %v1409_v52 = vsel %vm2921_vm9, %v1407_v40, %v1408_v50  ;;  %v983_v38 = vshll.u32 %v820_v22, 16  ;;  %v1446_v61 = vunpack.c.l.b16 %v1406_v47 }
  0xc5   : > { %v973_v42 = vrot.slane %v972_v34, 4  ;;  %v1447_v0 = vunpack.c.l.b16 %v1409_v52  ;;  %v982_v4 = vrot.slane %v980_v54, 4  ;;  %v1412_v14 = vrot.slane %v2956_v33, 5 }
  0xc6   : > { %2283 = vmatmul.msk.bf16.vlgmr.msrb.gmra.mxu2 %vm586_vm3, %v1456_v21  ;;  %2266 = vmatmul.msk.bf16.vlgmr.msrb.gmra.mxu1 %vm586_vm3, %v2947_v23  ;;  %v961_v21 = vrot.slane %v959_v12, 5  ;;  %v3002_v31 = vpack.c.b16 %v1038_v19, %v1037_v17  ;;  %v985_v2 = vrot.slane %v983_v38, 5  ;;  %v2278_v33 = vrot.slane %v1349_v16, 9 }
  0xc7   : > { %v978_v46 = vsel %vm2916_vm8, %v973_v42, %v977_v43  ;;  %v3036_v12 = vpack.c.b16 %v1447_v0, %v1446_v61  ;;  %v1013_v39 = vshll.u32 %v3050_v28, 16  ;;  %v1017_v40 = vshrl.u32 %v3050_v28, 16 }
  0xc8   : > { %v1040_v3 = vunpack.c.l.b16 %v978_v46  ;;  %v986_v17 = vor.u32 %v985_v2, %v982_v4  ;;  %v1413_v43 = vsel %vm2921_vm9, %v2278_v33, %v1412_v14  ;;  %v1419_v61 = vrot.slane %v2985_v7, 5  ;;  %v826_v33 = vld [vmem:[#allocation2 + $0x60] sm:$0xf] }
  0xc9   : > { %v1019_v46 = vrot.slane %v1017_v40, 4 }
  0xca   : > { %v987_v32 = vrot.slane %v986_v17, 4  ;;  %v1421_v17 = vrot.slane %v1419_v61, 4 }
  0xd4   : > { %2249 = vmatmul.msk.bf16.gmra.mxu3 %vm586_vm3, %v1046_v20  ;;  %2258 = vmatmul.msk.bf16.gmra.mxu0 %vm586_vm3, %v2947_v23  ;;  %v958_v20 = vrot.slane %v956_v11, 4 }
  0xd6   : > { %2284 = vmatmul.msk.bf16.gmra.mxu2 %vm586_vm3, %v2973_v62  ;;  %2267 = vmatmul.msk.bf16.gmra.mxu1 %vm586_vm3, %v2975_v63  ;;  %v962_v56 = vor.u32 %v961_v21, %v958_v20  ;;  %v999_v20 = vshll.u32 %v3032_v9, 16 }
  0xd8   : > { %v963_v41 = vrot.slane %v962_v56, 4  ;;  %v1001_v34 = vrot.slane %v999_v20, 5 }
  0xda   : > { %v968_v18 = vsel %vm2916_vm8, %v963_v41, %v967_v24  ;;  %v1414_v24 = vrot.slane %v1412_v14, 4 }
  0xdb   : > { %v1039_v1 = vunpack.c.l.b16 %v968_v18  ;;  %v1015_v18 = vrot.slane %v1013_v39, 5  ;;  %v1149_v39 = vshll.u32 %v826_v33, 16 }
  0xdd   : > { %v3038_v13 = vpack.c.b16 %v1040_v3, %v1039_v1  ;;  %v1350_v1 = vld [vmem:[#allocation2 + $0x3c] sm:$0xe]  ;;  %v1020_v4 = vor.u32 %v1019_v46, %v1015_v18 }
  0xde   : > { %v2279_v16 = vrot.slane %v1350_v1, 9 }
  0xdf   : > { %v1021_v20 = vrot.slane %v1020_v4, 4 }
  0xe1   : > { %v624_v30 = vpop.f32.mrf.mxu0 }
  0xe3   : > { %v684_v36 = vpop.f32.mrf.mxu1 }
  0xe4   : > { %v685_v37 = vadd.f32 %v684_v36, %v624_v30  ;;  %2250 = vmatmul.msk.bf16.gmra.mxu3 %vm586_vm3, %v2947_v23  ;;  %2259 = vmatmul.msk.bf16.gmra.mxu0 %vm586_vm3, %v2975_v63  ;;  %v3016_v23 = vld [vmem:[#allocation2 + $0x4c] sm:$0xf]  ;;  %v1415_v30 = vrot.slane %v2969_v57, 5  ;;  %v1004_v36 = vshrl.u32 %v823_v25, 16 }
  0xe5   : > { %v989_v58 = vshll.u32 %v3016_v23, 16  ;;  %v993_v59 = vshrl.u32 %v3016_v23, 16  ;;  %v1426_v1 = vrot.slane %v3016_v23, 5 }
  0xe6   : > { %2285 = vmatmul.msk.bf16.gmra.mxu2 %vm586_vm3, %v2999_v27  ;;  %2268 = vmatmul.msk.bf16.gmra.mxu1 %vm586_vm3, %v3002_v31  ;;  %v1416_v57 = vsel %vm2921_vm9, %v1414_v24, %v1415_v30  ;;  %v3088_v24 = vld [vmem:[#allocation2 + $0x64] sm:$0xf] }
  0xe7   : > { %v3014_v44 = vpop.f32.mrf.mxu3  ;;  %v991_v5 = vrot.slane %v989_v58, 5  ;;  %v995_v6 = vrot.slane %v993_v59, 4  ;;  %v1449_v54 = vunpack.c.l.b16 %v1416_v57  ;;  %v3067_v59 = vld [vmem:[#allocation2 + $0x5c] sm:$0x1]  ;;  %v1155_v40 = vshll.u32 %v3088_v24, 16 }
  0xe8   : > { %v1023_v2 = vshll.u32 %v3067_v59, 16  ;;  %v1428_v23 = vrot.slane %v1426_v1, 4 }
  0xe9   : > { %v746_v45 = vpop.f32.mrf.mxu2  ;;  %v626_v49 = vpop.f32.mrf.mxu0  ;;  %v996_v19 = vor.u32 %v995_v6, %v991_v5  ;;  %v992_v22 = vsel %vm2916_vm8, %v987_v32, %v991_v5 }
  0xea   : > { %v3020_v48 = vadd.f32 %v746_v45, %v685_v37  ;;  %v1007_v37 = vshll.u32 %v823_v25, 16  ;;  %v1041_v38 = vunpack.c.l.b16 %v992_v22 }
  0xeb   : > { %v686_v53 = vpop.f32.mrf.mxu1  ;;  %v997_v56 = vrot.slane %v996_v19, 4  ;;  %v1422_v19 = vrot.slane %v2997_v26, 5  ;;  %v1420_v26 = vsel %vm2921_vm9, %v2279_v16, %v1419_v61 }
  0xec   : > { %v687_v60 = vadd.f32 %v686_v53, %v626_v49  ;;  %v1006_v49 = vrot.slane %v1004_v36, 4  ;;  %v1009_v52 = vrot.slane %v1007_v37, 5  ;;  %v1448_v53 = vunpack.c.l.b16 %v1413_v43 }
  0xed   : > { %v1002_v45 = vsel %vm2916_vm8, %v997_v56, %v1001_v34 }
  0xee   : > { %v1042_v58 = vunpack.c.l.b16 %v1002_v45  ;;  %v1010_v3 = vor.u32 %v1009_v52, %v1006_v49  ;;  %v1157_v49 = vrot.slane %v1155_v40, 5 }
  0xef   : > { %v3030_v8 = vpop.f32.mrf.mxu3 }
  0xf0   : > { %v1011_v7 = vrot.slane %v1010_v3, 4 }
  0xf1   : > { %v748_v29 = vpop.f32.mrf.mxu2  ;;  %v629_v11 = vpop.f32.mrf.mxu0 }
  0xf2   : > { %v3034_v10 = vadd.f32 %v748_v29, %v687_v60  ;;  %v3075_v29 = vpack.c.b16 %v1449_v54, %v1448_v53  ;;  %v1016_v56 = vsel %vm2916_vm8, %v1011_v7, %v1015_v18  ;;  %v3109_v18 = vld [vmem:[#allocation2 + $0x68] sm:$0x1] }
  0xf3   : > { %v689_v15 = vpop.f32.mrf.mxu1  ;;  %v1043_v57 = vunpack.c.l.b16 %v1016_v56 }
  0xf4   : > { %v690_v21 = vadd.f32 %v689_v15, %v629_v11  ;;  %2251 = vmatmul.msk.bf16.gmra.mxu3 %vm586_vm3, %v2975_v63  ;;  %2260 = vmatmul.msk.bf16.gmra.mxu0 %vm586_vm3, %v3002_v31  ;;  %v3077_v11 = vpack.c.b16 %v1042_v58, %v1041_v38 }
  0xf6   : > { %2286 = vmatmul.msk.bf16.gmra.mxu2 %vm586_vm3, %v3036_v12  ;;  %2269 = vmatmul.msk.bf16.gmra.mxu1 %vm586_vm3, %v3038_v13 }
  0xf7   : > { %v3053_v63 = vpop.f32.mrf.mxu3 }
  0xf9   : > { %v751_v35 = vpop.f32.mrf.mxu2  ;;  %v631_v41 = vpop.f32.mrf.mxu0 }
  0xfa   : > { %v3057_v50 = vadd.f32 %v751_v35, %v690_v21  ;;  %v1025_v21 = vrot.slane %v1023_v2, 5  ;;  %v1146_v35 = vshrl.u32 %v826_v33, 16  ;;  %v1165_v2 = vshll.u32 %v3109_v18, 16 }
  0xfb   : > { %v691_v42 = vpop.f32.mrf.mxu1 }
  0xfc   : > { %v692_v47 = vadd.f32 %v691_v42, %v631_v41  ;;  %v1026_v34 = vsel %vm2916_vm8, %v1021_v20, %v1025_v21  ;;  %v1159_v41 = vshrl.u32 %v3088_v24, 16  ;;  %v1148_v45 = vrot.slane %v1146_v35, 4  ;;  %v829_v20 = vld [vmem:[#allocation2 + $0x6c] sm:$0xf] }
  0xfd   : > { %v1044_v22 = vunpack.c.l.b16 %v1026_v34  ;;  %v1249_v35 = vshll.u32 %v829_v20, 16 }
  0xfe   : > { %v1161_v52 = vrot.slane %v1159_v41, 4 }
  0xff   : > { %v3069_v60 = vpop.f32.mrf.mxu3  ;;  %v3118_v58 = vpack.c.b16 %v1044_v22, %v1043_v57 }
 0x100   : > { %v1162_v4 = vor.u32 %v1161_v52, %v1157_v49 }
 0x101   : > { %v753_v0 = vpop.f32.mrf.mxu2  ;;  %v634_v6 = vpop.f32.mrf.mxu0 }
 0x102   : > { %v3073_v5 = vadd.f32 %v753_v0, %v692_v47  ;;  %v1151_v47 = vrot.slane %v1149_v39, 5  ;;  %v1351_v0 = vld [vmem:[#allocation2 + $0x48] sm:$0xe] }
 0x103   : > { %v694_v14 = vpop.f32.mrf.mxu1 }
 0x104   : > { %v695_v15 = vadd.f32 %v694_v14, %v634_v6  ;;  %2252 = vmatmul.msk.bf16.gmra.mxu3 %vm586_vm3, %v3002_v31  ;;  %2261 = vmatmul.msk.bf16.gmra.mxu0 %vm586_vm3, %v3038_v13  ;;  %v1423_v31 = vsel %vm2921_vm9, %v1421_v17, %v1422_v19  ;;  %v1152_v3 = vor.u32 %v1151_v47, %v1148_v45  ;;  %v1163_v17 = vrot.slane %v1162_v4, 4 }
 0x105   : > { %v1451_v43 = vunpack.c.l.b16 %v1423_v31  ;;  %v1167_v19 = vrot.slane %v1165_v2, 5  ;;  %v1251_v45 = vrot.slane %v1249_v35, 5 }
 0x106   : > { %2287 = vmatmul.msk.bf16.gmra.mxu2 %vm586_vm3, %v3075_v29  ;;  %2270 = vmatmul.msk.bf16.gmra.mxu1 %vm586_vm3, %v3077_v11  ;;  %v1153_v16 = vrot.slane %v1152_v3, 4 }
 0x107   : > { %v714_v25 = vpop.f32.mrf.mxu3  ;;  %v1168_v56 = vsel %vm2916_vm8, %v1163_v17, %v1167_v19 }
 0x108   : > { %v3095_v30 = vadd.f32 %v714_v25, %v3014_v44  ;;  %v1450_v44 = vunpack.c.l.b16 %v1420_v26  ;;  %v1172_v57 = vunpack.c.l.b16 %v1168_v56 }
 0x109   : > { %v756_v32 = vpop.f32.mrf.mxu2  ;;  %v3103_v37 = vpop.f32.mrf.mxu0 }
 0x10a   : > { %v3101_v36 = vadd.f32 %v756_v32, %v695_v15  ;;  %v3116_v38 = vpack.c.b16 %v1451_v43, %v1450_v44  ;;  %v1429_v15 = vrot.slane %v3032_v9, 5  ;;  %v3131_v9 = vld [vmem:[#allocation2 + $0x70] sm:$0xf]  ;;  %v1158_v32 = vsel %vm2916_vm8, %v1153_v16, %v1157_v49 }
 0x10b   : > { %v3107_v42 = vpop.f32.mrf.mxu1  ;;  %v1255_v39 = vshll.u32 %v3131_v9, 16  ;;  %v1259_v40 = vshrl.u32 %v3131_v9, 16  ;;  %v1171_v43 = vunpack.c.l.b16 %v1158_v32 }
 0x10c   : > { %v1430_v31 = vsel %vm2921_vm9, %v1428_v23, %v1429_v15 }
 0x10d   : > { %v1453_v44 = vunpack.c.l.b16 %v1430_v31  ;;  %v1257_v47 = vrot.slane %v1255_v39, 5  ;;  %v1261_v52 = vrot.slane %v1259_v40, 4  ;;  %v1173_v4 = vpack.c.b16 %v1172_v57, %v1171_v43 }
 0x10f   : > { %v716_v46 = vpop.f32.mrf.mxu3 }
 0x110   : > { %v3112_v53 = vadd.f32 %v716_v46, %v3030_v8  ;;  %v2280_v8 = vrot.slane %v1351_v0, 9  ;;  %v3152_v46 = vld [vmem:[#allocation2 + $0x74] sm:$0x1] }
 0x111   : > { %v3114_v54 = vpop.f32.mrf.mxu2  ;;  %v639_v61 = vpop.f32.mrf.mxu0  ;;  %v1265_v23 = vshll.u32 %v3152_v46, 16 }
 0x112   : > { %v1427_v33 = vsel %vm2921_vm9, %v2280_v8, %v1426_v1  ;;  %v1262_v8 = vor.u32 %v1261_v52, %v1257_v47 }
 0x113   : > { %v699_v6 = vpop.f32.mrf.mxu1  ;;  %v1452_v41 = vunpack.c.l.b16 %v1427_v33 }
 0x114   : > { %v700_v14 = vadd.f32 %v699_v6, %v639_v61  ;;  %2253 = vmatmul.msk.bf16.gmra.mxu3 %vm586_vm3, %v3038_v13  ;;  %2262 = vmatmul.msk.bf16.gmra.mxu0 %vm586_vm3, %v3077_v11  ;;  %v1352_v6 = vld [vmem:[#allocation2 + $0x54] sm:$0xe] }
 0x115   : > { %v3157_v3 = vpack.c.b16 %v1453_v44, %v1452_v41  ;;  %v2281_v17 = vrot.slane %v1352_v6, 9 }
 0x116   : > { %2288 = vmatmul.msk.bf16.gmra.mxu2 %vm586_vm3, %v3116_v38  ;;  %2271 = vmatmul.msk.bf16.gmra.mxu1 %vm586_vm3, %v3118_v58 }
 0x117   : > { %v719_v7 = vpop.f32.mrf.mxu3 }
 0x118   : > { %v3134_v13 = vadd.f32 %v719_v7, %v3053_v63  ;;  %v1246_v63 = vshrl.u32 %v829_v20, 16  ;;  %v1263_v7 = vrot.slane %v1262_v8, 4  ;;  %v1267_v20 = vrot.slane %v1265_v23, 5 }
 0x119   : > { %v761_v21 = vpop.f32.mrf.mxu2  ;;  %v3140_v26 = vpop.f32.mrf.mxu0 }
 0x11a   : > { %v3138_v25 = vadd.f32 %v761_v21, %v700_v14  ;;  %v1248_v22 = vrot.slane %v1246_v63, 4  ;;  %v1433_v14 = vrot.slane %v3050_v28, 5  ;;  %v1268_v39 = vsel %vm2916_vm8, %v1263_v7, %v1267_v20  ;;  %v2412_v7 = vld [vmem:[%s3558_s5 + $0x64] sm:$0xf]  ;;  %v2363_v20 = vld [vmem:[%s3558_s5 + $0x68] sm:$0xf0] }
 0x11b   : > { %v3148_v34 = vpop.f32.mrf.mxu1  ;;  %v1272_v44 = vunpack.c.l.b16 %v1268_v39 }
 0x11c   : > { %v1252_v15 = vor.u32 %v1251_v45, %v1248_v22  ;;  %v1435_v28 = vrot.slane %v1433_v14, 4  ;;  %v1434_v56 = vsel %vm2921_vm9, %v2281_v17, %v1433_v14 }
 0x11e   : > { %v1253_v19 = vrot.slane %v1252_v15, 4 }
 0x11f   : > { %v721_v49 = vpop.f32.mrf.mxu3 }
 0x120   : > { %v722_v61 = vadd.f32 %v721_v49, %v3069_v60  ;;  %v1436_v60 = vrot.slane %v3067_v59, 5  ;;  %v1258_v35 = vsel %vm2916_vm8, %v1253_v19, %v1257_v47 }
 0x121   : > { %v3155_v0 = vpop.f32.mrf.mxu2  ;;  %v644_v1 = vpop.f32.mrf.mxu0  ;;  %v1271_v41 = vunpack.c.l.b16 %v1258_v35 }
 0x122   : > { %v1437_v63 = vsel %vm2921_vm9, %v1435_v28, %v1436_v60 }
 0x123   : > { %v704_v2 = vpop.f32.mrf.mxu1  ;;  %v1455_v40 = vunpack.c.l.b16 %v1437_v63  ;;  %v1273_v49 = vpack.c.b16 %v1272_v44, %v1271_v41  ;;  %v2413_v63 = vld [vmem:[%s3558_s5 + $0x64] sm:$0xf0]  ;;  %v2410_v44 = vld [vmem:[%s3558_s5 + $0x54] sm:$0xf] }
 0x124   : > { %v705_v16 = vadd.f32 %v704_v2, %v644_v1  ;;  %2254 = vmatmul.msk.bf16.gmra.mxu3 %vm586_vm3, %v3077_v11  ;;  %2263 = vmatmul.msk.bf16.gmra.mxu0 %vm586_vm3, %v3118_v58 }
 0x126   : > { %2289 = vmatmul.msk.bf16.gmra.mxu2 %vm586_vm3, %v3157_v3  ;;  %2272 = vmatmul.msk.bf16.gmra.mxu1 %vm586_vm3, %v1173_v4 }
 0x127   : > { %v776_v21 = vpop.f32.mrf.mxu3 }
 0x128   : > { %v3170_v31 = vadd.f32 %v776_v21, %v3095_v30  ;;  %v1454_v30 = vunpack.c.l.b16 %v1434_v56 }
 0x129   : > { %v766_v33 = vpop.f32.mrf.mxu2  ;;  %v3174_v32 = vpop.f32.mrf.mxu0 }
 0x12a   : > { %v3172_v11 = vadd.f32 %v766_v33, %v705_v16  ;;  %v3191_v52 = vpack.c.b16 %v1455_v40, %v1454_v30  ;;  %v2415_v16 = vld [vmem:[%s3558_s5 + $0x74] sm:$0xf0]  ;;  %v2366_v33 = vor.u32 %v2412_v7, %v2363_v20 }
 0x12b   : > { %v3176_v59 = vpop.f32.mrf.mxu1 }
 0x12f   : > { %v778_v43 = vpop.f32.mrf.mxu3 }
 0x130   : > { %v3189_v22 = vadd.f32 %v778_v43, %v3112_v53  ;;  %v2355_v43 = vld [vmem:[%s3558_s5 + $0x58] sm:$0xf0] }
 0x131   : > { %v3186_v57 = vpop.f32.mrf.mxu2  ;;  %v649_v45 = vpop.f32.mrf.mxu0 }
 0x133   : > { %v709_v1 = vpop.f32.mrf.mxu1 }
 0x134   : > { %v710_v2 = vadd.f32 %v709_v1, %v649_v45  ;;  %2255 = vmatmul.msk.bf16.gmra.mxu3 %vm586_vm3, %v3118_v58  ;;  %2264 = vmatmul.msk.bf16.gmra.mxu0 %vm586_vm3, %v1173_v4  ;;  %v2414_v58 = vld [vmem:[%s3558_s5 + $0x74] sm:$0xf]  ;;  %v2371_v4 = vld [vmem:[%s3558_s5 + $0x78] sm:$0xf0] }
 0x135   : > { %v2374_v15 = vor.u32 %v2414_v58, %v2371_v4 }
 0x136   : > { %2290 = vmatmul.msk.bf16.gmra.mxu2 %vm586_vm3, %v3191_v52  ;;  %2273 = vmatmul.msk.bf16.gmra.mxu1 %vm586_vm3, %v1273_v49  ;;  %v2358_v49 = vor.u32 %v2410_v44, %v2355_v43 }
 0x137   : > { %v781_v51 = vpop.f32.mrf.mxu3  ;;  %1923 = vmatpush.bf16.msra.mxu2 %v2374_v15 }
 0x138   : > { %v3200_v53 = vadd.f32 %v781_v51, %v3134_v13  ;;  %v2369_v13 = vld [vmem:[%s3558_s5 + $0x70] sm:$0xf] }
 0x139   : > { %v771_v47 = vpop.f32.mrf.mxu2  ;;  %v3204_v14 = vpop.f32.mrf.mxu0  ;;  %v2370_v17 = vor.u32 %v2415_v16, %v2369_v13  ;;  %v2347_v13 = vld [vmem:[%s3558_s5 + $0x48] sm:$0xf0] }
 0x13a   : > { %v3202_v6 = vadd.f32 %v771_v47, %v710_v2  ;;  %v2411_v2 = vld [vmem:[%s3558_s5 + $0x54] sm:$0xf0] }
 0x13b   : > { %1874 = vmatpush.bf16.msra.mxu1 %v2370_v17  ;;  %1924 = vmatpush.bf16.msra.mxu2 %v2366_v33 }
 0x13f   : > { %v783_v8 = vpop.f32.mrf.mxu3  ;;  %1925 = vmatpush.bf16.msra.mxu2 %v2358_v49  ;;  %v2404_v49 = vld [vmem:[%s3558_s5 + $0x24] sm:$0xf] }
 0x140   : > { %v3212_v23 = vadd.f32 %v783_v8, %v722_v61  ;;  %v2408_v8 = vld [vmem:[%s3558_s5 + $0x44] sm:$0xf] }
 0x141   : > { %v1189_v60 = vpop.f32.mrf.mxu0 }
 0x144   : > { %2293 = vmatmul.msk.bf16.vlgmr.msra.gmra.mxu3 %vm586_vm3, %v2973_v62  ;;  %2303 = vmatmul.msk.bf16.vlgmr.msra.gmra.mxu0 %vm586_vm3, %v2999_v27 }
 0x147   : > { %v1089_v28 = vpop.f32.mrf.mxu3 }
 0x148   : > { %v1129_v61 = vadd.f32 %v1089_v28, %v3020_v48  ;;  %v2361_v48 = vld [vmem:[%s3558_s5 + $0x60] sm:$0xf] }
 0x149   : > { %v1191_v19 = vpop.f32.mrf.mxu0  ;;  %v2362_v39 = vor.u32 %v2413_v63, %v2361_v48 }
 0x14a   : > { %v3231_v21 = vadd.f32 %v1189_v60, %v1129_v61  ;;  %v2350_v60 = vor.u32 %v2408_v8, %v2347_v13  ;;  %v2345_v61 = vld [vmem:[%s3558_s5 + $0x40] sm:$0xf] }
 0x14b   : > { %1875 = vmatpush.bf16.msra.mxu1 %v2362_v39 }
 0x14c   : > { %1926 = vmatpush.bf16.msra.mxu2 %v2350_v60  ;;  %v1564_v60 = vrot.slane %v3109_v18, 5 }
 0x14f   : > { %v1091_v62 = vpop.f32.mrf.mxu3 }
 0x150   : > { %v1130_v56 = vadd.f32 %v1091_v62, %v3034_v10  ;;  %v2406_v62 = vld [vmem:[%s3558_s5 + $0x34] sm:$0xf] }
 0x151   : > { %v1194_v35 = vpop.f32.mrf.mxu0 }
 0x152   : > { %v3240_v30 = vadd.f32 %v1191_v19, %v1130_v56  ;;  %v2409_v19 = vld [vmem:[%s3558_s5 + $0x44] sm:$0xf0]  ;;  %v2339_v56 = vld [vmem:[%s3558_s5 + $0x38] sm:$0xf0] }
 0x153   : > { %v2346_v20 = vor.u32 %v2409_v19, %v2345_v61  ;;  %v2342_v63 = vor.u32 %v2406_v62, %v2339_v56  ;;  %v2323_v19 = vld [vmem:[%s3558_s5 + $0x18] sm:$0xf0] }
 0x154   : > { %2294 = vmatmul.msk.bf16.gmra.mxu3 %vm586_vm3, %v2999_v27  ;;  %2304 = vmatmul.msk.bf16.gmra.mxu0 %vm586_vm3, %v3036_v12 }
 0x155   : > { %1927 = vmatpush.bf16.msra.mxu2 %v2342_v63 }
 0x157   : > { %v1094_v10 = vpop.f32.mrf.mxu3 }
 0x158   : > { %v1131_v40 = vadd.f32 %v1094_v10, %v3057_v50  ;;  %v2353_v50 = vld [vmem:[%s3558_s5 + $0x50] sm:$0xf] }
 0x159   : > { %v1196_v41 = vpop.f32.mrf.mxu0  ;;  %v2354_v47 = vor.u32 %v2411_v2, %v2353_v50  ;;  %v2337_v10 = vld [vmem:[%s3558_s5 + $0x30] sm:$0xf] }
 0x15a   : > { %v3253_v45 = vadd.f32 %v1194_v35, %v1131_v40  ;;  %v2407_v40 = vld [vmem:[%s3558_s5 + $0x34] sm:$0xf0] }
 0x15b   : > { %1876 = vmatpush.bf16.msra.mxu1 %v2354_v47  ;;  %v2338_v44 = vor.u32 %v2407_v40, %v2337_v10  ;;  %v2329_v47 = vld [vmem:[%s3558_s5 + $0x20] sm:$0xf]  ;;  %v1647_v10 = vrot.slane %v3131_v9, 5 }
 0x15f   : > { %v1096_v27 = vpop.f32.mrf.mxu3  ;;  %1877 = vmatpush.bf16.msra.mxu1 %v2346_v20  ;;  %v773_v20 = vpop.f32.mrf.mxu2 }
 0x160   : > { %v1132_v1 = vadd.f32 %v1096_v27, %v3073_v5  ;;  %v2331_v27 = vld [vmem:[%s3558_s5 + $0x28] sm:$0xf0] }
 0x161   : > { %v1199_v51 = vpop.f32.mrf.mxu0  ;;  %v2334_v50 = vor.u32 %v2404_v49, %v2331_v27 }
 0x162   : > { %v3262_v58 = vadd.f32 %v1196_v41, %v1132_v1 }
 0x163   : > { %1878 = vmatpush.bf16.msra.mxu1 %v2338_v44  ;;  %1928 = vmatpush.bf16.msra.mxu2 %v2334_v50 }
 0x164   : > { %2295 = vmatmul.msk.bf16.gmra.mxu3 %vm586_vm3, %v3036_v12  ;;  %2305 = vmatmul.msk.bf16.gmra.mxu0 %vm586_vm3, %v3075_v29  ;;  %v697_v12 = vadd.f32 %v3107_v42, %v3103_v37 }
 0x166   : > { %v791_v17 = vadd.f32 %v3114_v54, %v697_v12 }
 0x167   : > { %v1099_v5 = vpop.f32.mrf.mxu3  ;;  %v1500_v44 = vpop.f32.mrf.mxu2 }
 0x168   : > { %v1133_v4 = vadd.f32 %v1099_v5, %v3101_v36  ;;  %v2405_v5 = vld [vmem:[%s3558_s5 + $0x24] sm:$0xf0] }
 0x169   : > { %v1201_v15 = vpop.f32.mrf.mxu0  ;;  %v2330_v8 = vor.u32 %v2405_v5, %v2329_v47  ;;  %v2400_v47 = vld [vmem:[%s3558_s5 + $0x4] sm:$0xf] }
 0x16a   : > { %v3275_v16 = vadd.f32 %v1199_v51, %v1133_v4 }
 0x16b   : > { %1879 = vmatpush.bf16.msra.mxu1 %v2330_v8 }
 0x16f   : > { %v1101_v28 = vpop.f32.mrf.mxu3 }
 0x170   : > { %v1134_v36 = vadd.f32 %v1101_v28, %v791_v17  ;;  %v711_v17 = vpop.f32.mrf.mxu1 }
 0x171   : > { %v1204_v7 = vpop.f32.mrf.mxu0 }
 0x172   : > { %v3286_v33 = vadd.f32 %v1201_v15, %v1134_v36  ;;  %v1561_v15 = vrot.slane %v3088_v24, 5 }
 0x174   : > { %2296 = vmatmul.msk.bf16.gmra.mxu3 %vm586_vm3, %v3075_v29  ;;  %2306 = vmatmul.msk.bf16.gmra.mxu0 %vm586_vm3, %v3116_v38  ;;  %v702_v29 = vadd.f32 %v3148_v34, %v3140_v26 }
 0x176   : > { %v793_v35 = vadd.f32 %v3155_v0, %v702_v29 }
 0x177   : > { %v1104_v37 = vpop.f32.mrf.mxu3 }
 0x178   : > { %v1135_v42 = vadd.f32 %v1104_v37, %v3138_v25  ;;  %v1289_v56 = vpop.f32.mrf.mxu1 }
 0x179   : > { %v1206_v54 = vpop.f32.mrf.mxu0 }
 0x17a   : > { %v3299_v48 = vadd.f32 %v1204_v7, %v1135_v42 }
 0x17f   : > { %v1106_v39 = vpop.f32.mrf.mxu3 }
 0x180   : > { %v1136_v25 = vadd.f32 %v1106_v39, %v793_v35  ;;  %v2321_v35 = vld [vmem:[%s3558_s5 + $0x10] sm:$0xf]  ;;  %v2403_v39 = vld [vmem:[%s3558_s5 + $0x14] sm:$0xf0] }
 0x181   : > { %v1209_v41 = vpop.f32.mrf.mxu0 }
 0x182   : > { %v3310_v43 = vadd.f32 %v1206_v54, %v1136_v25 }
 0x184   : > { %2297 = vmatmul.msk.bf16.gmra.mxu3 %vm586_vm3, %v3116_v38  ;;  %2307 = vmatmul.msk.bf16.gmra.mxu0 %vm586_vm3, %v3157_v3  ;;  %v707_v38 = vadd.f32 %v3176_v59, %v3174_v32  ;;  %v1353_v32 = vld [vmem:[#allocation2 + $0x60] sm:$0xe] }
 0x185   : > { %v2291_v59 = vrot.slane %v1353_v32, 9 }
 0x186   : > { %v795_v2 = vadd.f32 %v3186_v57, %v707_v38  ;;  %v1563_v57 = vrot.slane %v1561_v15, 4 }
 0x187   : > { %v1109_v26 = vpop.f32.mrf.mxu3  ;;  %v1562_v36 = vsel %vm2921_vm9, %v2291_v59, %v1561_v15 }
 0x188   : > { %v1137_v34 = vadd.f32 %v1109_v26, %v3172_v11  ;;  %v1565_v61 = vsel %vm2921_vm9, %v1563_v57, %v1564_v60  ;;  %v1568_v37 = vunpack.c.l.b16 %v1562_v36  ;;  %v2313_v57 = vld [vmem:[%s3558_s5] sm:$0xf]  ;;  %v2401_v60 = vld [vmem:[%s3558_s5 + $0x4] sm:$0xf0] }
 0x189   : > { %v1211_v0 = vpop.f32.mrf.mxu0  ;;  %v1569_v42 = vunpack.c.l.b16 %v1565_v61 }
 0x18a   : > { %v3323_v1 = vadd.f32 %v1209_v41, %v1137_v34  ;;  %v1354_v41 = vld [vmem:[#allocation2 + $0x6c] sm:$0xe]  ;;  %v1649_v34 = vrot.slane %v1647_v10, 4 }
 0x18b   : > { %v1570_v29 = vpack.c.b16 %v1569_v42, %v1568_v37  ;;  %v2301_v26 = vrot.slane %v1354_v41, 9  ;;  %v1329_v37 = vadd.f32 %v1289_v56, %v3231_v21 }
 0x18d   : > { %v1648_v9 = vsel %vm2921_vm9, %v2301_v26, %v1647_v10 }
 0x18f   : > { %v1111_v51 = vpop.f32.mrf.mxu3 }
 0x190   : > { %v1138_v11 = vadd.f32 %v1111_v51, %v795_v2  ;;  %v1291_v2 = vpop.f32.mrf.mxu1 }
 0x191   : > { %v1214_v4 = vpop.f32.mrf.mxu0 }
 0x192   : > { %v3335_v13 = vadd.f32 %v1211_v0, %v1138_v11  ;;  %v1650_v0 = vrot.slane %v3152_v46, 5  ;;  %v2315_v46 = vld [vmem:[%s3558_s5 + $0x8] sm:$0xf0] }
 0x194   : > { %2298 = vmatmul.msk.bf16.gmra.mxu3 %vm586_vm3, %v3157_v3  ;;  %2308 = vmatmul.msk.bf16.gmra.mxu0 %vm586_vm3, %v3191_v52  ;;  %v2402_v3 = vld [vmem:[%s3558_s5 + $0x14] sm:$0xf]  ;;  %v1651_v38 = vsel %vm2921_vm9, %v1649_v34, %v1650_v0 }
 0x195   : > { %v2326_v7 = vor.u32 %v2402_v3, %v2323_v19  ;;  %v1655_v11 = vunpack.c.l.b16 %v1651_v38 }
 0x197   : > { %v1114_v12 = vpop.f32.mrf.mxu3  ;;  %1929 = vmatpush.bf16.msra.mxu2 %v2326_v7 }
 0x198   : > { %v1139_v28 = vadd.f32 %v1114_v12, %v3202_v6  ;;  %v712_v6 = vadd.f32 %v711_v17, %v3204_v14  ;;  %v2322_v14 = vor.u32 %v2403_v39, %v2321_v35  ;;  %v1294_v59 = vpop.f32.mrf.mxu1  ;;  %v2314_v12 = vor.u32 %v2401_v60, %v2313_v57 }
 0x199   : > { %v1216_v24 = vpop.f32.mrf.mxu0 }
 0x19a   : > { %v3353_v18 = vadd.f32 %v1214_v4, %v1139_v28  ;;  %v797_v54 = vadd.f32 %v773_v20, %v712_v6  ;;  %1880 = vmatpush.bf16.msra.mxu1 %v2322_v14  ;;  %v2318_v4 = vor.u32 %v2400_v47, %v2315_v46 }
 0x19c   : > { %1930 = vmatpush.bf16.msra.mxu2 %v2318_v4 }
 0x19e   : > { %1881 = vmatpush.bf16.msra.mxu1 %v2314_v12 }
 0x19f   : > { %v1116_v62 = vpop.f32.mrf.mxu3 }
 0x1a0   : > { %v1140_v63 = vadd.f32 %v1116_v62, %v797_v54  ;;  %v1296_v61 = vpop.f32.mrf.mxu1  ;;  %v1540_v54 = vadd.f32 %v1500_v44, %v1329_v37  ;;  %v1331_v44 = vadd.f32 %v1294_v59, %v3253_v45 }
 0x1a1   : > { %v1219_v25 = vpop.f32.mrf.mxu0 }
 0x1a2   : > { %v3363_v40 = vadd.f32 %v1216_v24, %v1140_v63 }
 0x1a4   : > { %2299 = vmatmul.msk.bf16.gmra.mxu3 %vm586_vm3, %v3191_v52  ;;  %2309 = vmatmul.msk.bf16.gmra.mxu0 %vm586_vm3, %v1570_v29  ;;  %v1654_v52 = vunpack.c.l.b16 %v1648_v9 }
 0x1a6   : > { %v1656_v55 = vpack.c.b16 %v1655_v11, %v1654_v52 }
 0x1a7   : > { %v1119_v49 = vpop.f32.mrf.mxu3 }
 0x1a8   : > { %v1141_v27 = vadd.f32 %v1119_v49, %v3170_v31  ;;  %v1502_v31 = vpop.f32.mrf.mxu2  ;;  %v1299_v62 = vpop.f32.mrf.mxu1 }
 0x1a9   : > { %v1221_v50 = vpop.f32.mrf.mxu0 }
 0x1aa   : > { %v3374_v51 = vadd.f32 %v1219_v25, %v1141_v27 }
 0x1af   : > { %v1121_v5 = vpop.f32.mrf.mxu3 }
 0x1b0   : > { %v1142_v15 = vadd.f32 %v1121_v5, %v3189_v22  ;;  %v1505_v28 = vpop.f32.mrf.mxu2  ;;  %v1301_v26 = vpop.f32.mrf.mxu1 }
 0x1b1   : > { %v1224_v8 = vpop.f32.mrf.mxu0 }
 0x1b2   : > { %v3383_v32 = vadd.f32 %v1221_v50, %v1142_v15  ;;  %v1542_v50 = vadd.f32 %v1505_v28, %v1331_v44 }
 0x1b4   : > { %2300 = vmatmul.msk.bf16.gmra.mxu3 %vm586_vm3, %v1570_v29  ;;  %2310 = vmatmul.msk.bf16.gmra.mxu0 %vm586_vm3, %v1656_v55 }
 0x1b7   : > { %v1124_v22 = vpop.f32.mrf.mxu3 }
 0x1b8   : > { %v1143_v17 = vadd.f32 %v1124_v22, %v3200_v53  ;;  %v1507_v6 = vpop.f32.mrf.mxu2  ;;  %v1330_v53 = vadd.f32 %v1291_v2, %v3240_v30  ;;  %v1332_v2 = vadd.f32 %v1296_v61, %v3262_v58  ;;  %v1304_v11 = vpop.f32.mrf.mxu1 }
 0x1b9   : > { %v1226_v24 = vpop.f32.mrf.mxu0 }
 0x1ba   : > { %v3394_v36 = vadd.f32 %v1224_v8, %v1143_v17  ;;  %v1541_v39 = vadd.f32 %v1502_v31, %v1330_v53  ;;  %v1543_v47 = vadd.f32 %v1507_v6, %v1332_v2  ;;  %v1333_v8 = vadd.f32 %v1299_v62, %v3275_v16 }
 0x1bf   : > { %v1126_v3 = vpop.f32.mrf.mxu3 }
 0x1c0   : > { %v1144_v19 = vadd.f32 %v1126_v3, %v3212_v23  ;;  %v1510_v35 = vpop.f32.mrf.mxu2  ;;  %v3404_v23 = vld [vmem:[%s3557_s4] ss:$0 sm:$0xff]  ;;  %v1306_v57 = vpop.f32.mrf.mxu1 }
 0x1c1   : > { %v1672_v7 = vpop.f32.mrf.mxu0  ;;  %v1544_v22 = vadd.f32 %v1510_v35, %v1333_v8 }
 0x1c2   : > { %v3397_v20 = vadd.f32 %v1226_v24, %v1144_v19  ;;  %v1334_v24 = vadd.f32 %v1301_v26, %v3286_v33 }
 0x1c7   : > { %v1586_v42 = vpop.f32.mrf.mxu3 }
 0x1c8   : > { %v1626_v29 = vadd.f32 %v1586_v42, %v1540_v54  ;;  %v1512_v49 = vpop.f32.mrf.mxu2  ;;  %v1309_v37 = vpop.f32.mrf.mxu1 }
 0x1c9   : > { %v1674_v63 = vpop.f32.mrf.mxu0  ;;  %v1545_v19 = vadd.f32 %v1512_v49, %v1334_v24 }
 0x1ca   : > { %v1712_v25 = vadd.f32 %v1672_v7, %v1626_v29 }
 0x1cc   : > { %v1732_v21 = vadd.f32 %v3404_v23, %v1712_v25 }
 0x1ce   : > { %v1748_v34 = vmax.f32 %v1732_v21, 0.0 }
 0x1cf   : > { %v1588_v10 = vpop.f32.mrf.mxu3 }
 0x1d0   : > { %v1627_v14 = vadd.f32 %v1588_v10, %v1541_v39  ;;  %v1515_v45 = vpop.f32.mrf.mxu2  ;;  %v1311_v26 = vpop.f32.mrf.mxu1 }
 0x1d1   : > { %v1677_v41 = vpop.f32.mrf.mxu0 }
 0x1d2   : > { %v1713_v56 = vadd.f32 %v1674_v63, %v1627_v14  ;;  %v1335_v63 = vadd.f32 %v1304_v11, %v3299_v48 }
 0x1d4   : > { %v1733_v30 = vadd.f32 %v3404_v23, %v1713_v56  ;;  %v1546_v25 = vadd.f32 %v1515_v45, %v1335_v63 }
 0x1d6   : > { %v1749_v0 = vmax.f32 %v1733_v30, 0.0 }
 0x1d7   : > { %v1591_v27 = vpop.f32.mrf.mxu3 }
 0x1d8   : > { %v1764_v9 = vpack.c.bf16 %v1749_v0, %v1748_v34  ;;  %v1628_v52 = vadd.f32 %v1591_v27, %v1542_v50  ;;  %v1517_v3 = vpop.f32.mrf.mxu2  ;;  %v1337_v50 = vadd.f32 %v1309_v37, %v3323_v1 }
 0x1d9   : > { %v1679_v38 = vpop.f32.mrf.mxu0 }
 0x1da   : > { %1882 = vmatmul.bf16.vlgmr.msra.gmra.mxu1 %v1764_v9  ;;  %1931 = vmatmul.bf16.vlgmr.msra.gmra.mxu2 %v1764_v9  ;;  %v1714_v46 = vadd.f32 %v1677_v41, %v1628_v52  ;;  %v1336_v41 = vadd.f32 %v1306_v57, %v3310_v43  ;;  %v1314_v9 = vpop.f32.mrf.mxu1 }
 0x1dc   : > { %v1734_v15 = vadd.f32 %v3404_v23, %v1714_v46  ;;  %v1547_v56 = vadd.f32 %v1517_v3, %v1336_v41 }
 0x1de   : > { %v1750_v60 = vmax.f32 %v1734_v15, 0.0 }
 0x1df   : > { %v1593_v31 = vpop.f32.mrf.mxu3 }
 0x1e0   : > { %v1629_v5 = vadd.f32 %v1593_v31, %v1543_v47  ;;  %v1520_v29 = vpop.f32.mrf.mxu2 }
 0x1e1   : > { %v1682_v4 = vpop.f32.mrf.mxu0  ;;  %v1548_v11 = vadd.f32 %v1520_v29, %v1337_v50 }
 0x1e2   : > { %v1715_v55 = vadd.f32 %v1679_v38, %v1629_v5  ;;  %v1338_v5 = vadd.f32 %v1311_v26, %v3335_v13  ;;  %v1316_v15 = vpop.f32.mrf.mxu1 }
 0x1e4   : > { %v1735_v59 = vadd.f32 %v3404_v23, %v1715_v55 }
 0x1e6   : > { %v1751_v58 = vmax.f32 %v1735_v59, 0.0 }
 0x1e7   : > { %v1596_v12 = vpop.f32.mrf.mxu3 }
 0x1e8   : > { %v1765_v17 = vpack.c.bf16 %v1751_v58, %v1750_v60  ;;  %v1630_v61 = vadd.f32 %v1596_v12, %v1544_v22  ;;  %v1522_v30 = vpop.f32.mrf.mxu2  ;;  %v1339_v12 = vadd.f32 %v1314_v9, %v3353_v18 }
 0x1e9   : > { %v1684_v28 = vpop.f32.mrf.mxu0 }
 0x1ea   : > { %1887 = vmatmul.bf16.gmra.mxu1 %v1765_v17  ;;  %1936 = vmatmul.bf16.gmra.mxu2 %v1765_v17  ;;  %v1716_v7 = vadd.f32 %v1682_v4, %v1630_v61  ;;  %v1549_v4 = vadd.f32 %v1522_v30, %v1338_v5  ;;  %v1319_v61 = vpop.f32.mrf.mxu1 }
 0x1ec   : > { %v1736_v54 = vadd.f32 %v3404_v23, %v1716_v7  ;;  %v1340_v7 = vadd.f32 %v1316_v15, %v3363_v40 }
 0x1ee   : > { %v1752_v35 = vmax.f32 %v1736_v54, 0.0 }
 0x1ef   : > { %v1598_v6 = vpop.f32.mrf.mxu3 }
 0x1f0   : > { %v1631_v16 = vadd.f32 %v1598_v6, %v1545_v19  ;;  %v1525_v46 = vpop.f32.mrf.mxu2 }
 0x1f1   : > { %v1687_v42 = vpop.f32.mrf.mxu0  ;;  %v1550_v24 = vadd.f32 %v1525_v46, %v1339_v12 }
 0x1f2   : > { %v1717_v62 = vadd.f32 %v1684_v28, %v1631_v16  ;;  %v1321_v18 = vpop.f32.mrf.mxu1 }
 0x1f3   : > { %v1342_v26 = vadd.f32 %v1321_v18, %v3383_v32 }
 0x1f4   : > { %v1737_v53 = vadd.f32 %v3404_v23, %v1717_v62 }
 0x1f6   : > { %v1753_v33 = vmax.f32 %v1737_v53, 0.0 }
 0x1f7   : > { %v1601_v39 = vpop.f32.mrf.mxu3 }
 0x1f8   : > { %v1766_v10 = vpack.c.bf16 %v1753_v33, %v1752_v35  ;;  %v1632_v21 = vadd.f32 %v1601_v39, %v1546_v25  ;;  %v1527_v58 = vpop.f32.mrf.mxu2  ;;  %v1341_v35 = vadd.f32 %v1319_v61, %v3374_v51 }
 0x1f9   : > { %v1689_v14 = vpop.f32.mrf.mxu0  ;;  %v1551_v16 = vadd.f32 %v1527_v58, %v1340_v7  ;;  %v1788_v58 = vld [vmem:[%s3559_s6] sm:$0x3] }
 0x1fa   : > { %1892 = vmatmul.bf16.gmra.mxu1 %v1766_v10  ;;  %1941 = vmatmul.bf16.gmra.mxu2 %v1766_v10  ;;  %v1718_v44 = vadd.f32 %v1687_v42, %v1632_v21  ;;  %v3439_v12 = vperm.slane %v1788_v58, 0 }
 0x1fc   : > { %v1738_v49 = vadd.f32 %v3404_v23, %v1718_v44 }
 0x1fe   : > { %v1754_v2 = vmax.f32 %v1738_v49, 0.0 }
 0x1ff   : > { %v1603_v34 = vpop.f32.mrf.mxu3 }
 0x200   : > { %v1633_v48 = vadd.f32 %v1603_v34, %v1547_v56  ;;  %v1530_v37 = vpop.f32.mrf.mxu2  ;;  %v1324_v56 = vpop.f32.mrf.mxu1 }
 0x201   : > { %v1692_v0 = vpop.f32.mrf.mxu0  ;;  %v1343_v50 = vadd.f32 %v1324_v56, %v3394_v36 }
 0x202   : > { %v1719_v27 = vadd.f32 %v1689_v14, %v1633_v48  ;;  %v1552_v14 = vadd.f32 %v1530_v37, %v1341_v35 }
 0x204   : > { %v1739_v38 = vadd.f32 %v3404_v23, %v1719_v27 }
 0x206   : > { %v1755_v43 = vmax.f32 %v1739_v38, 0.0 }
 0x207   : > { %v1606_v52 = vpop.f32.mrf.mxu3 }
 0x208   : > { %v1767_v47 = vpack.c.bf16 %v1755_v43, %v1754_v2  ;;  %v1634_v45 = vadd.f32 %v1606_v52, %v1548_v11  ;;  %v1532_v40 = vpop.f32.mrf.mxu2  ;;  %v1326_v38 = vpop.f32.mrf.mxu1 }
 0x209   : > { %v1694_v31 = vpop.f32.mrf.mxu0  ;;  %v1553_v30 = vadd.f32 %v1532_v40, %v1342_v26  ;;  %v1344_v46 = vadd.f32 %v1326_v38, %v3397_v20 }
 0x20a   : > { %1897 = vmatmul.bf16.gmra.mxu1 %v1767_v47  ;;  %1946 = vmatmul.bf16.gmra.mxu2 %v1767_v47  ;;  %v1720_v55 = vadd.f32 %v1692_v0, %v1634_v45 }
 0x20c   : > { %v1740_v57 = vadd.f32 %v3404_v23, %v1720_v55 }
 0x20e   : > { %v1756_v17 = vmax.f32 %v1740_v57, 0.0 }
 0x20f   : > { %v1608_v8 = vpop.f32.mrf.mxu3 }
 0x210   : > { %v1635_v1 = vadd.f32 %v1608_v8, %v1549_v4  ;;  %v1535_v51 = vpop.f32.mrf.mxu2 }
 0x211   : > { %v1697_v59 = vpop.f32.mrf.mxu0  ;;  %v1554_v11 = vadd.f32 %v1535_v51, %v1343_v50 }
 0x212   : > { %v1721_v60 = vadd.f32 %v1694_v31, %v1635_v1 }
 0x214   : > { %v1741_v22 = vadd.f32 %v3404_v23, %v1721_v60 }
 0x216   : > { %v1757_v28 = vmax.f32 %v1741_v22, 0.0 }
 0x217   : > { %v1611_v13 = vpop.f32.mrf.mxu3 }
 0x218   : > { %v1768_v3 = vpack.c.bf16 %v1757_v28, %v1756_v17  ;;  %v1636_v6 = vadd.f32 %v1611_v13, %v1550_v24  ;;  %v1537_v5 = vpop.f32.mrf.mxu2  ;;  %v3443_v28 = vperm.slane %v1788_v58, 1 }
 0x219   : > { %v1699_v19 = vpop.f32.mrf.mxu0  ;;  %v1555_v45 = vadd.f32 %v1537_v5, %v1344_v46 }
 0x21a   : > { %1902 = vmatmul.bf16.gmra.mxu1 %v1768_v3  ;;  %1951 = vmatmul.bf16.gmra.mxu2 %v1768_v3  ;;  %v1722_v42 = vadd.f32 %v1697_v59, %v1636_v6 }
 0x21c   : > { %v1742_v63 = vadd.f32 %v3404_v23, %v1722_v42 }
 0x21e   : > { %v1758_v39 = vmax.f32 %v1742_v63, 0.0 }
 0x21f   : > { %v1613_v54 = vpop.f32.mrf.mxu3 }
 0x220   : > { %v1637_v62 = vadd.f32 %v1613_v54, %v1551_v16 }
 0x221   : > { %v1702_v29 = vpop.f32.mrf.mxu0 }
 0x222   : > { %v1723_v53 = vadd.f32 %v1699_v19, %v1637_v62 }
 0x224   : > { %v1743_v33 = vadd.f32 %v3404_v23, %v1723_v53 }
 0x226   : > { %v1759_v25 = vmax.f32 %v1743_v33, 0.0 }
 0x227   : > { %v1616_v10 = vpop.f32.mrf.mxu3 }
 0x228   : > { %v1769_v41 = vpack.c.bf16 %v1759_v25, %v1758_v39  ;;  %v1638_v21 = vadd.f32 %v1616_v10, %v1552_v14 }
 0x229   : > { %v1704_v44 = vpop.f32.mrf.mxu0 }
 0x22a   : > { %1907 = vmatmul.bf16.gmra.mxu1 %v1769_v41  ;;  %1956 = vmatmul.bf16.gmra.mxu2 %v1769_v41  ;;  %v1724_v34 = vadd.f32 %v1702_v29, %v1638_v21 }
 0x22c   : > { %v1744_v49 = vadd.f32 %v3404_v23, %v1724_v34 }
 0x22e   : > { %v1760_v2 = vmax.f32 %v1744_v49, 0.0 }
 0x22f   : > { %v1618_v48 = vpop.f32.mrf.mxu3 }
 0x230   : > { %v1639_v0 = vadd.f32 %v1618_v48, %v1553_v30 }
 0x231   : > { %v1707_v43 = vpop.f32.mrf.mxu0 }
 0x232   : > { %v1725_v27 = vadd.f32 %v1704_v44, %v1639_v0 }
 0x234   : > { %v1745_v9 = vadd.f32 %v3404_v23, %v1725_v27 }
 0x236   : > { %v1761_v32 = vmax.f32 %v1745_v9, 0.0 }
 0x237   : > { %v1621_v52 = vpop.f32.mrf.mxu3 }
 0x238   : > { %v1770_v47 = vpack.c.bf16 %v1761_v32, %v1760_v2  ;;  %v1640_v31 = vadd.f32 %v1621_v52, %v1554_v11 }
 0x239   : > { %v1709_v55 = vpop.f32.mrf.mxu0 }
 0x23a   : > { %1912 = vmatmul.bf16.gmra.mxu1 %v1770_v47  ;;  %1961 = vmatmul.bf16.gmra.mxu2 %v1770_v47  ;;  %v1726_v4 = vadd.f32 %v1707_v43, %v1640_v31 }
 0x23c   : > { %v1746_v8 = vadd.f32 %v3404_v23, %v1726_v4 }
 0x23e   : > { %v1762_v57 = vmax.f32 %v1746_v8, 0.0 }
 0x23f   : > { %v1623_v15 = vpop.f32.mrf.mxu3 }
 0x240   : > { %v1641_v36 = vadd.f32 %v1623_v15, %v1555_v45 }
 0x242   : > { %v1727_v1 = vadd.f32 %v1709_v55, %v1641_v36 }
 0x244   : > { %v1747_v59 = vadd.f32 %v3404_v23, %v1727_v1 }
 0x246   : > { %v1763_v60 = vmax.f32 %v1747_v59, 0.0 }
 0x248   : > { %v1771_v20 = vpack.c.bf16 %v1763_v60, %v1762_v57 }
 0x24a   : > { %1917 = vmatmul.bf16.gmra.mxu1 %v1771_v20  ;;  %1966 = vmatmul.bf16.gmra.mxu2 %v1771_v20 }
 0x257   : > { %v1883_v22 = vpop.f32.mrf.mxu1 }
 0x258   : > { %v1884_v17 = vadd.f32 %v1883_v22, %v3439_v12 }
 0x25a   : > { %1972 = vst [vmem:[%s2796_s10] sm:$0xff] %v1884_v17 }
 0x25d   : > { %v1932_v23 = vpop.f32.mrf.mxu2 }
 0x25e   : > { %v1933_v13 = vadd.f32 %v1932_v23, %v3443_v28 }
 0x25f   : > { %v1885_v24 = vpop.f32.mrf.mxu1 }
 0x260   : > { %1973 = vst [vmem:[%s2796_s10 + $0x8] sm:$0xff] %v1933_v13  ;;  %v1886_v61 = vadd.f32 %v1885_v24, %v3439_v12 }
 0x262   : > { %1974 = vst [vmem:[%s2796_s10 + $0x10] sm:$0xff] %v1886_v61 }
 0x265   : > { %v1934_v3 = vpop.f32.mrf.mxu2 }
 0x266   : > { %v1935_v19 = vadd.f32 %v1934_v3, %v3443_v28 }
 0x267   : > { %v1888_v7 = vpop.f32.mrf.mxu1 }
 0x268   : > { %1975 = vst [vmem:[%s2796_s10 + $0x18] sm:$0xff] %v1935_v19  ;;  %v1889_v6 = vadd.f32 %v1888_v7, %v3439_v12 }
 0x26a   : > { %1976 = vst [vmem:[%s2796_s10 + $0x20] sm:$0xff] %v1889_v6 }
 0x26d   : > { %v1937_v37 = vpop.f32.mrf.mxu2 }
 0x26e   : > { %v1938_v16 = vadd.f32 %v1937_v37, %v3443_v28 }
 0x26f   : > { %v1890_v42 = vpop.f32.mrf.mxu1 }
 0x270   : > { %1977 = vst [vmem:[%s2796_s10 + $0x28] sm:$0xff] %v1938_v16  ;;  %v1891_v54 = vadd.f32 %v1890_v42, %v3439_v12 }
 0x272   : > { %1978 = vst [vmem:[%s2796_s10 + $0x30] sm:$0xff] %v1891_v54 }
 0x275   : > { %v1939_v62 = vpop.f32.mrf.mxu2 }
 0x276   : > { %v1940_v18 = vadd.f32 %v1939_v62, %v3443_v28 }
 0x277   : > { %v1893_v63 = vpop.f32.mrf.mxu1 }
 0x278   : > { %1979 = vst [vmem:[%s2796_s10 + $0x38] sm:$0xff] %v1940_v18  ;;  %v1894_v53 = vadd.f32 %v1893_v63, %v3439_v12 }
 0x27a   : > { %1980 = vst [vmem:[%s2796_s10 + $0x40] sm:$0xff] %v1894_v53 }
 0x27d   : > { %v1942_v29 = vpop.f32.mrf.mxu2 }
 0x27e   : > { %v1943_v35 = vadd.f32 %v1942_v29, %v3443_v28 }
 0x27f   : > { %v1895_v33 = vpop.f32.mrf.mxu1 }
 0x280   : > { %1981 = vst [vmem:[%s2796_s10 + $0x48] sm:$0xff] %v1943_v35  ;;  %v1896_v39 = vadd.f32 %v1895_v33, %v3439_v12 }
 0x282   : > { %1982 = vst [vmem:[%s2796_s10 + $0x50] sm:$0xff] %v1896_v39 }
 0x285   : > { %v1944_v25 = vpop.f32.mrf.mxu2 }
 0x286   : > { %v1945_v40 = vadd.f32 %v1944_v25, %v3443_v28 }
 0x287   : > { %v1898_v10 = vpop.f32.mrf.mxu1 }
 0x288   : > { %1983 = vst [vmem:[%s2796_s10 + $0x58] sm:$0xff] %v1945_v40  ;;  %v1899_v14 = vadd.f32 %v1898_v10, %v3439_v12 }
 0x28a   : > { %1984 = vst [vmem:[%s2796_s10 + $0x60] sm:$0xff] %v1899_v14 }
 0x28d   : > { %v1947_v41 = vpop.f32.mrf.mxu2 }
 0x28e   : > { %v1948_v26 = vadd.f32 %v1947_v41, %v3443_v28 }
 0x28f   : > { %v1900_v21 = vpop.f32.mrf.mxu1 }
 0x290   : > { %1985 = vst [vmem:[%s2796_s10 + $0x68] sm:$0xff] %v1948_v26  ;;  %v1901_v56 = vadd.f32 %v1900_v21, %v3439_v12 }
 0x292   : > { %1986 = vst [vmem:[%s2796_s10 + $0x70] sm:$0xff] %v1901_v56 }
 0x295   : > { %v1949_v44 = vpop.f32.mrf.mxu2 }
 0x296   : > { %v1950_v30 = vadd.f32 %v1949_v44, %v3443_v28 }
 0x297   : > { %v1903_v34 = vpop.f32.mrf.mxu1 }
 0x298   : > { %1987 = vst [vmem:[%s2796_s10 + $0x78] sm:$0xff] %v1950_v30  ;;  %v1904_v48 = vadd.f32 %v1903_v34, %v3439_v12 }
 0x29a   : > { %1988 = vst [vmem:[%s2796_s10 + $0x80] sm:$0xff] %v1904_v48 }
 0x29d   : > { %v1952_v0 = vpop.f32.mrf.mxu2 }
 0x29e   : > { %v1953_v51 = vadd.f32 %v1952_v0, %v3443_v28 }
 0x29f   : > { %v1905_v49 = vpop.f32.mrf.mxu1 }
 0x2a0   : > { %1989 = vst [vmem:[%s2796_s10 + $0x88] sm:$0xff] %v1953_v51  ;;  %v1906_v27 = vadd.f32 %v1905_v49, %v3439_v12 }
 0x2a2   : > { %1990 = vst [vmem:[%s2796_s10 + $0x90] sm:$0xff] %v1906_v27 }
 0x2a5   : > { %v1954_v50 = vpop.f32.mrf.mxu2 }
 0x2a6   : > { %v1955_v9 = vadd.f32 %v1954_v50, %v3443_v28 }
 0x2a7   : > { %v1908_v38 = vpop.f32.mrf.mxu1 }
 0x2a8   : > { %1991 = vst [vmem:[%s2796_s10 + $0x98] sm:$0xff] %v1955_v9  ;;  %v1909_v2 = vadd.f32 %v1908_v38, %v3439_v12 }
 0x2aa   : > { %1992 = vst [vmem:[%s2796_s10 + $0xa0] sm:$0xff] %v1909_v2 }
 0x2ad   : > { %v1957_v32 = vpop.f32.mrf.mxu2 }
 0x2ae   : > { %v1958_v43 = vadd.f32 %v1957_v32, %v3443_v28 }
 0x2af   : > { %v1910_v52 = vpop.f32.mrf.mxu1 }
 0x2b0   : > { %1993 = vst [vmem:[%s2796_s10 + $0xa8] sm:$0xff] %v1958_v43  ;;  %v1911_v11 = vadd.f32 %v1910_v52, %v3439_v12 }
 0x2b2   : > { %1994 = vst [vmem:[%s2796_s10 + $0xb0] sm:$0xff] %v1911_v11 }
 0x2b5   : > { %v1959_v47 = vpop.f32.mrf.mxu2 }
 0x2b6   : > { %v1960_v46 = vadd.f32 %v1959_v47, %v3443_v28 }
 0x2b7   : > { %v1913_v31 = vpop.f32.mrf.mxu1 }
 0x2b8   : > { %1995 = vst [vmem:[%s2796_s10 + $0xb8] sm:$0xff] %v1960_v46  ;;  %v1914_v5 = vadd.f32 %v1913_v31, %v3439_v12 }
 0x2ba   : > { %1996 = vst [vmem:[%s2796_s10 + $0xc0] sm:$0xff] %v1914_v5 }
 0x2bd   : > { %v1962_v45 = vpop.f32.mrf.mxu2 }
 0x2be   : > { %v1963_v4 = vadd.f32 %v1962_v45, %v3443_v28 }
 0x2bf   : > { %v1915_v15 = vpop.f32.mrf.mxu1 }
 0x2c0   : > { %1997 = vst [vmem:[%s2796_s10 + $0xc8] sm:$0xff] %v1963_v4  ;;  %v1916_v36 = vadd.f32 %v1915_v15, %v3439_v12 }
 0x2c2   : > { %1998 = vst [vmem:[%s2796_s10 + $0xd0] sm:$0xff] %v1916_v36 }
 0x2c5   : > { %v1964_v55 = vpop.f32.mrf.mxu2 }
 0x2c6   : > { %v1965_v8 = vadd.f32 %v1964_v55, %v3443_v28 }
 0x2c7   : > { %v1918_v1 = vpop.f32.mrf.mxu1 }
 0x2c8   : > { %1999 = vst [vmem:[%s2796_s10 + $0xd8] sm:$0xff] %v1965_v8  ;;  %v1919_v59 = vadd.f32 %v1918_v1, %v3439_v12 }
 0x2ca   : > { %2000 = vst [vmem:[%s2796_s10 + $0xe0] sm:$0xff] %v1919_v59 }
 0x2cd   : > { %v1967_v57 = vpop.f32.mrf.mxu2 }
 0x2ce   : > { %v1968_v60 = vadd.f32 %v1967_v57, %v3443_v28 }
 0x2cf   : > { %v1920_v20 = vpop.f32.mrf.mxu1 }
 0x2d0   : > { %2001 = vst [vmem:[%s2796_s10 + $0xe8] sm:$0xff] %v1968_v60  ;;  %v1921_v58 = vadd.f32 %v1920_v20, %v3439_v12 }
 0x2d2   : > { %2002 = vst [vmem:[%s2796_s10 + $0xf0] sm:$0xff] %v1921_v58 }
 0x2d5   : > { %v1969_v22 = vpop.f32.mrf.mxu2 }
 0x2d6   : > { %v1970_v17 = vadd.f32 %v1969_v22, %v3443_v28 }
 0x2d8   : > { %2003 = vst [vmem:[%s2796_s10 + $0xf8] sm:$0xff] %v1970_v17 }
 0x2d9   : > { %2527 = shalt.err (!%p2524_p1)
}
 0x2da   : > { %s2598_s10 = smov 256   ;;  %s2599_s13 = smov 16  }
 0x2db   : > { %2424 = dma.vmem_to_hbm [thread:$0]  (%p2691_p3), %s2021_s27, 4096, %s2023_s28, %s2005_s30, %s2598_s10, %s2598_s10, %s2599_s13  }
 0x2dc PF: > { %p2430_p2 = scmp.ge.s32.totalorder %s2594_s8, 2  ;;  %s2037_s16 = sand.u32 1, %s2566_s24  }
 0x2dd   : > { %s2038_s17 = scalar_lea.sflag [#allocation4], %s2037_s16 }
 0x2de   : > { %p2427_p4 = pnand %p2430_p2, %p2700_p8 }
 0x2e0   : > { %p2428_p5 = pneg %p2427_p4 }
 0x2e2   : > { %2561 = dma.done.wait (%p2428_p5), %s2038_s17, 4096  }
 0x2e3   : > { %2563 = vsyncadd (%p2428_p5), %s2038_s17, 4294963200  ;;  %s20_s8 = sadd.s32 1, %s2594_s8   ;;  %s3576_s28 = sld [smem:[#allocation6_spill]] }
 0x2e4   : > { %p17_p6 = scmp.ge.s32.totalorder %s20_s8, 6   ;;  %s3577_s14 = sld [smem:[#allocation7_spill]] }
 0x2e5   : > { %s3578_s30 = sld [smem:[#allocation8_spill]]  ;;  %s3579_s24 = smov %s2570_s25 }
 0x2e6   : > { %s3580_s25 = smov %s2574_s26  ;;  %s3581_s26 = smov %s2709_s19 }
 0x2e7   : > { %s3582_s27 = smov %s2586_s29  ;;  %19 = sbr.rel (!%p17_p6) target bundleno = 5 (0x5), region = 116 }
 0x2ea   : > { %s3583_s29 = smov %s3577_s14 }
 0x2ec   :  { %2044 = vsyncpa [#allocation4], 1 }
 0x2ed   :  { %2046 = vsyncpa [#allocation4 + $0x1], 1 }

</bundles_post_ra>
